<compile_context>
chip_gen: v7x
topology: tpu7x:2x2x1
jax: 0.10.0
libtpu: 0.0.40
codegen_flags: <defaults>
</compile_context>

<pallas_src>
import jax
import jax.numpy as jnp
from jax import lax
from jax.experimental import pallas as pl
from jax.experimental.pallas import tpu as pltpu


_ONEHOT_MAX_VOCAB = 2048   # above this the (tile, V) one-hot stops being cheap
_DMA_SLOTS = 8             # in-flight row DMAs for the HBM-gather path
_GATHER_UNROLL = 16        # hide scalar id/address math under the vld/vst stream


def _round_up(x: int, m: int) -> int:
    return ((x + m - 1) // m) * m


def _vmem_budget_bytes() -> int:
    """Generation-aware per-core VMEM budget (~75% of physical capacity)."""
    cap = 64 * 1024 * 1024            # conservative default = v7x per-TC VMEM
    try:
        cap = int(pltpu.get_tpu_info().vmem_capacity_bytes)
    except Exception:
        pass
    return int(cap * 0.75)            # v5e/v6e: ~96 MiB, v7x: ~48 MiB


# --------------------------------------------------------------------------- #
# Kernels
# --------------------------------------------------------------------------- #
def _onehot_kernel(tok_ref, table_ref, out_ref):
    """Small-vocab path: one-hot @ table on the MXU -> dense (tile, D) stores."""
    tile = out_ref.shape[0]
    vocab = table_ref.shape[0]
    ids = tok_ref[...]                                            # (tile, 1) int32
    iota = lax.broadcasted_iota(jnp.int32, (tile, vocab), 1)      # vocab ids on lanes
    onehot = (ids == iota).astype(table_ref.dtype)                # (tile, V)
    # Out-of-range ids match nothing -> zero row (nn.Embedding would raise).
    acc = jnp.dot(onehot, table_ref[...], preferred_element_type=jnp.float32)
    out_ref[...] = acc.astype(out_ref.dtype)


def _vmem_gather_kernel(tok_smem, n_smem, table_ref, out_ref):
    """Resident-table path: per-row dynamic-slice copies from a single-buffered
    VMEM table, driven by scalar-prefetched (SMEM) token ids."""
    tile = out_ref.shape[0]
    vocab = table_ref.shape[0]
    base = pl.program_id(0) * tile
    n_valid = n_smem[0]

    def body(r, carry):
        # Skip padded tail rows of the last tile (no wasted gathers).
        @pl.when(base + r < n_valid)
        def _():
            # Clamp: VMEM refs have no runtime bounds check.
            tid = jnp.clip(tok_smem[base + r], 0, vocab - 1)
            out_ref[pl.ds(r, 1), :] = table_ref[pl.ds(tid, 1), :]
        return carry

    lax.fori_loop(0, tile, body, 0, unroll=_GATHER_UNROLL)


def _hbm_gather_kernel(tok_smem, n_smem, table_hbm, out_ref, sem):
    """Large-table path: gather rows straight from the HBM-resident table with
    async DMAs (zero table VMEM footprint; gather runs on the DMA engines)."""
    tile = out_ref.shape[0]
    vocab = table_hbm.shape[0]
    base = pl.program_id(0) * tile
    rows = jnp.minimum(tile, n_smem[0] - base)        # valid rows in this tile
    nslots = sem.shape[0]

    def start_copy(r):
        tid = jnp.clip(tok_smem[base + r], 0, vocab - 1)
        pltpu.make_async_copy(table_hbm.at[pl.ds(tid, 1), :],
                              out_ref.at[pl.ds(r, 1), :],
                              sem.at[r % nslots]).start()

    def wait_copy(r):
        # The wait descriptor only needs a matching transfer size on the same sem.
        pltpu.make_async_copy(table_hbm.at[pl.ds(0, 1), :],
                              out_ref.at[pl.ds(r, 1), :],
                              sem.at[r % nslots]).wait()

    def issue(r, carry):
        @pl.when(r >= nslots)
        def _():
            wait_copy(r - nslots)       # free this slot's previous copy first
        start_copy(r)
        return carry

    lax.fori_loop(0, rows, issue, 0)

    def drain(r, carry):
        wait_copy(r)
        return carry

    lax.fori_loop(jnp.maximum(rows - nslots, 0), rows, drain, 0)


# --------------------------------------------------------------------------- #
# Wrappers
# --------------------------------------------------------------------------- #
def _compiler_params(budget):
    return pltpu.CompilerParams(dimension_semantics=("parallel",),
                                vmem_limit_bytes=budget)


def _single_buffered_table_spec():
    # Whole table placed in VMEM once (single buffer) instead of a constant-index
    # blocked operand that Pallas would double-buffer (2x the table footprint).
    return pl.BlockSpec(memory_space=pltpu.MemorySpace.VMEM)


def _run_onehot(tok_col, table, padded_n, tile, budget):
    V, D = table.shape

    def call(table_spec):
        return pl.pallas_call(
            _onehot_kernel,
            out_shape=jax.ShapeDtypeStruct((padded_n, D), table.dtype),
            grid=(padded_n // tile,),
            in_specs=[pl.BlockSpec((tile, 1), lambda i: (i, 0)), table_spec],
            out_specs=pl.BlockSpec((tile, D), lambda i: (i, 0)),
            compiler_params=_compiler_params(budget),
        )(tok_col, table)

    try:
        return call(_single_buffered_table_spec())
    except Exception:   # fallback: double-buffered constant-index table block
        return call(pl.BlockSpec((V, D), lambda i: (0, 0)))


def _run_vmem_gather(tok_flat, n_arr, table, padded_n, tile, budget):
    V, D = table.shape
    dtype = table.dtype
    # 2-byte tables (bf16/fp16): view rows as uint32 so each (1, D) row copy
    # issues half the vld/vst ops (the vst slot is the binding unit of this loop).
    packed = dtype.itemsize == 2 and D % 2 == 0
    if packed:
        tbl = lax.bitcast_convert_type(table.reshape(V, D // 2, 2), jnp.uint32)
    else:
        tbl = table
    Dp = tbl.shape[1]

    def call(table_spec):
        return pl.pallas_call(
            _vmem_gather_kernel,
            out_shape=jax.ShapeDtypeStruct((padded_n, Dp), tbl.dtype),
            grid_spec=pltpu.PrefetchScalarGridSpec(
                num_scalar_prefetch=2,            # token ids + valid count -> SMEM
                grid=(padded_n // tile,),
                in_specs=[table_spec],
                out_specs=pl.BlockSpec((tile, Dp), lambda i, tok, n: (i, 0)),
            ),
            compiler_params=_compiler_params(budget),
        )(tok_flat, n_arr, tbl)

    try:
        out = call(_single_buffered_table_spec())
    except Exception:   # fallback: double-buffered constant-index table block
        out = call(pl.BlockSpec((V, Dp), lambda i, tok, n: (0, 0)))

    if packed:
        out = lax.bitcast_convert_type(out, dtype).reshape(padded_n, D)
    return out


def _run_hbm_gather(tok_flat, n_arr, table, padded_n, tile, budget):
    V, D = table.shape
    return pl.pallas_call(
        _hbm_gather_kernel,
        out_shape=jax.ShapeDtypeStruct((padded_n, D), table.dtype),
        grid_spec=pltpu.PrefetchScalarGridSpec(
            num_scalar_prefetch=2,
            grid=(padded_n // tile,),
            in_specs=[pl.BlockSpec(memory_space=pl.ANY)],   # table stays in HBM
            out_specs=pl.BlockSpec((tile, D), lambda i, tok, n: (i, 0)),
            scratch_shapes=[pltpu.SemaphoreType.DMA((_DMA_SLOTS,))],
        ),
        compiler_params=_compiler_params(budget),
    )(tok_flat, n_arr, table)


def embed_tokens(input_text: jax.Array, embed_table: jax.Array, *,
                 tile_tokens: int = 512, seq_len=None, force_path=None) -> jax.Array:
    """Pallas equivalent of InputTokensToEmbeddings.forward.

    input_text:  [B, S] integer token ids
    embed_table: [V, D] float embedding weights
    returns:     [B, S, D] (same dtype as embed_table)
    """
    assert input_text.ndim == 2
    if seq_len is not None:
        assert input_text.shape[1] == seq_len
    B, S = input_text.shape
    V, D = embed_table.shape
    N = B * S
    itemsize = embed_table.dtype.itemsize

    budget = _vmem_budget_bytes()

    # Large tiles amortize the ~0.35us per-grid-step overhead; multiple of 8.
    tile = min(tile_tokens, _round_up(N, 8))
    padded_n = _round_up(N, tile)

    tok_flat = input_text.reshape(N).astype(jnp.int32)
    if padded_n != N:
        tok_flat = jnp.pad(tok_flat, (0, padded_n - N))
    n_arr = jnp.array([N], dtype=jnp.int32)

    table_bytes = V * D * itemsize
    out_buf_bytes = 2 * tile * D * itemsize        # double-buffered output tiles
    onehot_bytes = tile * V * 4                    # one-hot working set (f32 est.)

    if force_path is not None:
        path = force_path
    elif (itemsize <= 2 and V <= _ONEHOT_MAX_VOCAB
          and table_bytes + out_buf_bytes + onehot_bytes <= budget):
        path = "onehot"          # exact for <=2-byte tables, dense MXU stores
    elif table_bytes + out_buf_bytes <= int(0.9 * budget):
        path = "vmem_gather"     # single-buffered resident table
    else:
        path = "hbm_gather"      # DMA gather from the HBM table

    if path == "onehot":
        out_flat = _run_onehot(tok_flat.reshape(padded_n, 1), embed_table,
                               padded_n, tile, budget)
    elif path == "vmem_gather":
        out_flat = _run_vmem_gather(tok_flat, n_arr, embed_table,
                                    padded_n, tile, budget)
    elif path == "hbm_gather":
        out_flat = _run_hbm_gather(tok_flat, n_arr, embed_table,
                                   padded_n, tile, budget)
    else:
        raise ValueError(f"unknown path: {path!r}")

    return out_flat[:N].reshape(B, S, D)


# --------------------------------------------------------------------------- #
# Demo / correctness check
# --------------------------------------------------------------------------- #
if __name__ == "__main__":
    # Module config (small, consistent with the forward pass).
    batch, seq_len, vocab_size, embed_dim = 2, 8, 32, 32

    key = jax.random.PRNGKey(0)
    k_tab, k_tok = jax.random.split(key)

    # nn.Embedding default init is N(0, 1).
    table_f32 = jax.random.normal(k_tab, (vocab_size, embed_dim), dtype=jnp.float32)
    input_text = jax.random.randint(k_tok, (batch, seq_len), 0, vocab_size,
                                    dtype=jnp.int32)
    ref_f32 = table_f32[input_text]

    # Default dispatch for f32 tables -> resident-VMEM gather path.
    out = jax.block_until_ready(embed_tokens(input_text, table_f32, seq_len=seq_len))
    assert out.shape == (batch, seq_len, embed_dim)
    assert out.dtype == table_f32.dtype
    assert jnp.allclose(out, ref_f32, atol=1e-6), "vmem_gather (default) mismatch"

    # HBM DMA-gather path (normally used when the table exceeds the VMEM budget).
    out_hbm = jax.block_until_ready(
        embed_tokens(input_text, table_f32, force_path="hbm_gather"))
    assert jnp.allclose(out_hbm, ref_f32, atol=1e-6), "hbm_gather mismatch"

    # bf16 table: exercises the uint32-packed row copies and the one-hot MXU path.
    table_bf16 = table_f32.astype(jnp.bfloat16)
    ref_bf16 = table_bf16[input_text].astype(jnp.float32)

    out_packed = jax.block_until_ready(
        embed_tokens(input_text, table_bf16, force_path="vmem_gather"))
    assert out_packed.dtype == jnp.bfloat16
    assert jnp.array_equal(out_packed.astype(jnp.float32), ref_bf16), \
        "packed (uint32-bitcast) gather mismatch"

    # Default dispatch for a small bf16 vocab -> one-hot MXU path (exact in
    # practice; loose tolerance only guards against MXU precision-mode quirks).
    out_oh = jax.block_until_ready(embed_tokens(input_text, table_bf16))
    assert out_oh.dtype == jnp.bfloat16
    assert jnp.allclose(out_oh.astype(jnp.float32), ref_bf16,
                        atol=1e-2, rtol=1e-2), "one-hot MXU path mismatch"

    print("KERNEL_OK")
</pallas_src>

<mosaic_0001>
module attributes {stable_mosaic.version = 11 : i64} {
  func.func @_vmem_gather_kernel(%arg0: i32, %arg1: memref<16xi32, #tpu.memory_space<smem>>, %arg2: memref<1xi32, #tpu.memory_space<smem>>, %arg3: memref<32x32xf32, #tpu.memory_space<vmem>>, %arg4: memref<16x32xf32, #tpu.memory_space<vmem>>) attributes {dimension_semantics = [#tpu.dimension_semantics<parallel>], iteration_bounds = array<i64: 1>, scalar_prefetch = 2 : i64, scratch_operands = 0 : i64, tpu.core_type = #tpu.core_type<tc>, window_params = [{pipeline_mode = #tpu.pipeline_mode<synchronous>, transform_indices = @transform_0, window_bounds = array<i64: 32, 32>}, {transform_indices = @transform_1, window_bounds = array<i64: 16, 32>}]} {
    %c16_i32 = arith.constant 16 : i32
    %0 = arith.muli %arg0, %c16_i32 : i32
    %c0 = arith.constant 0 : index
    %1 = memref.load %arg2[%c0] : memref<1xi32, #tpu.memory_space<smem>>
    %c0_i32 = arith.constant 0 : i32
    %2 = arith.addi %0, %c0_i32 : i32
    %3 = arith.cmpi slt, %2, %1 : i32
    %4 = arith.extui %3 : i1 to i32
    %c0_i32_0 = arith.constant 0 : i32
    %5 = arith.cmpi ne, %4, %c0_i32_0 : i32
    scf.if %5 {
      %66 = arith.addi %0, %c0_i32 : i32
      %67 = arith.index_cast %66 : i32 to index
      %68 = memref.load %arg1[%67] : memref<16xi32, #tpu.memory_space<smem>>
      %c0_i32_17 = arith.constant 0 : i32
      %c31_i32 = arith.constant 31 : i32
      %69 = arith.maxsi %c0_i32_17, %68 : i32
      %70 = arith.minsi %c31_i32, %69 : i32
      %71 = arith.index_cast %70 : i32 to index
      %c0_18 = arith.constant 0 : index
      %72 = vector.load %arg3[%71, %c0_18] : memref<32x32xf32, #tpu.memory_space<vmem>>, vector<1x32xf32>
      %73 = arith.index_cast %c0_i32 : i32 to index
      %c0_19 = arith.constant 0 : index
      %74 = vector.load %arg4[%73, %c0_19] : memref<16x32xf32, #tpu.memory_space<vmem>>, vector<1x32xf32>
      tpu.vector_store %arg4[%73, %c0_19], %72 {strides = array<i32>} : memref<16x32xf32, #tpu.memory_space<vmem>>, vector<1x32xf32>,
    } else {
    }
    %c1_i32 = arith.constant 1 : i32
    %6 = arith.addi %0, %c1_i32 : i32
    %7 = arith.cmpi slt, %6, %1 : i32
    %8 = arith.extui %7 : i1 to i32
    %c0_i32_1 = arith.constant 0 : i32
    %9 = arith.cmpi ne, %8, %c0_i32_1 : i32
    scf.if %9 {
      %66 = arith.addi %0, %c1_i32 : i32
      %67 = arith.index_cast %66 : i32 to index
      %68 = memref.load %arg1[%67] : memref<16xi32, #tpu.memory_space<smem>>
      %c0_i32_17 = arith.constant 0 : i32
      %c31_i32 = arith.constant 31 : i32
      %69 = arith.maxsi %c0_i32_17, %68 : i32
      %70 = arith.minsi %c31_i32, %69 : i32
      %71 = arith.index_cast %70 : i32 to index
      %c0_18 = arith.constant 0 : index
      %72 = vector.load %arg3[%71, %c0_18] : memref<32x32xf32, #tpu.memory_space<vmem>>, vector<1x32xf32>
      %73 = arith.index_cast %c1_i32 : i32 to index
      %c0_19 = arith.constant 0 : index
      %74 = vector.load %arg4[%73, %c0_19] : memref<16x32xf32, #tpu.memory_space<vmem>>, vector<1x32xf32>
      tpu.vector_store %arg4[%73, %c0_19], %72 {strides = array<i32>} : memref<16x32xf32, #tpu.memory_space<vmem>>, vector<1x32xf32>,
    } else {
    }
    %c2_i32 = arith.constant 2 : i32
    %10 = arith.addi %0, %c2_i32 : i32
    %11 = arith.cmpi slt, %10, %1 : i32
    %12 = arith.extui %11 : i1 to i32
    %c0_i32_2 = arith.constant 0 : i32
    %13 = arith.cmpi ne, %12, %c0_i32_2 : i32
    scf.if %13 {
      %66 = arith.addi %0, %c2_i32 : i32
      %67 = arith.index_cast %66 : i32 to index
      %68 = memref.load %arg1[%67] : memref<16xi32, #tpu.memory_space<smem>>
      %c0_i32_17 = arith.constant 0 : i32
      %c31_i32 = arith.constant 31 : i32
      %69 = arith.maxsi %c0_i32_17, %68 : i32
      %70 = arith.minsi %c31_i32, %69 : i32
      %71 = arith.index_cast %70 : i32 to index
      %c0_18 = arith.constant 0 : index
      %72 = vector.load %arg3[%71, %c0_18] : memref<32x32xf32, #tpu.memory_space<vmem>>, vector<1x32xf32>
      %73 = arith.index_cast %c2_i32 : i32 to index
      %c0_19 = arith.constant 0 : index
      %74 = vector.load %arg4[%73, %c0_19] : memref<16x32xf32, #tpu.memory_space<vmem>>, vector<1x32xf32>
      tpu.vector_store %arg4[%73, %c0_19], %72 {strides = array<i32>} : memref<16x32xf32, #tpu.memory_space<vmem>>, vector<1x32xf32>,
    } else {
    }
    %c3_i32 = arith.constant 3 : i32
    %14 = arith.addi %0, %c3_i32 : i32
    %15 = arith.cmpi slt, %14, %1 : i32
    %16 = arith.extui %15 : i1 to i32
    %c0_i32_3 = arith.constant 0 : i32
    %17 = arith.cmpi ne, %16, %c0_i32_3 : i32
    scf.if %17 {
      %66 = arith.addi %0, %c3_i32 : i32
      %67 = arith.index_cast %66 : i32 to index
      %68 = memref.load %arg1[%67] : memref<16xi32, #tpu.memory_space<smem>>
      %c0_i32_17 = arith.constant 0 : i32
      %c31_i32 = arith.constant 31 : i32
      %69 = arith.maxsi %c0_i32_17, %68 : i32
      %70 = arith.minsi %c31_i32, %69 : i32
      %71 = arith.index_cast %70 : i32 to index
      %c0_18 = arith.constant 0 : index
      %72 = vector.load %arg3[%71, %c0_18] : memref<32x32xf32, #tpu.memory_space<vmem>>, vector<1x32xf32>
      %73 = arith.index_cast %c3_i32 : i32 to index
      %c0_19 = arith.constant 0 : index
      %74 = vector.load %arg4[%73, %c0_19] : memref<16x32xf32, #tpu.memory_space<vmem>>, vector<1x32xf32>
      tpu.vector_store %arg4[%73, %c0_19], %72 {strides = array<i32>} : memref<16x32xf32, #tpu.memory_space<vmem>>, vector<1x32xf32>,
    } else {
    }
    %c4_i32 = arith.constant 4 : i32
    %18 = arith.addi %0, %c4_i32 : i32
    %19 = arith.cmpi slt, %18, %1 : i32
    %20 = arith.extui %19 : i1 to i32
    %c0_i32_4 = arith.constant 0 : i32
    %21 = arith.cmpi ne, %20, %c0_i32_4 : i32
    scf.if %21 {
      %66 = arith.addi %0, %c4_i32 : i32
      %67 = arith.index_cast %66 : i32 to index
      %68 = memref.load %arg1[%67] : memref<16xi32, #tpu.memory_space<smem>>
      %c0_i32_17 = arith.constant 0 : i32
      %c31_i32 = arith.constant 31 : i32
      %69 = arith.maxsi %c0_i32_17, %68 : i32
      %70 = arith.minsi %c31_i32, %69 : i32
      %71 = arith.index_cast %70 : i32 to index
      %c0_18 = arith.constant 0 : index
      %72 = vector.load %arg3[%71, %c0_18] : memref<32x32xf32, #tpu.memory_space<vmem>>, vector<1x32xf32>
      %73 = arith.index_cast %c4_i32 : i32 to index
      %c0_19 = arith.constant 0 : index
      %74 = vector.load %arg4[%73, %c0_19] : memref<16x32xf32, #tpu.memory_space<vmem>>, vector<1x32xf32>
      tpu.vector_store %arg4[%73, %c0_19], %72 {strides = array<i32>} : memref<16x32xf32, #tpu.memory_space<vmem>>, vector<1x32xf32>,
    } else {
    }
    %c5_i32 = arith.constant 5 : i32
    %22 = arith.addi %0, %c5_i32 : i32
    %23 = arith.cmpi slt, %22, %1 : i32
    %24 = arith.extui %23 : i1 to i32
    %c0_i32_5 = arith.constant 0 : i32
    %25 = arith.cmpi ne, %24, %c0_i32_5 : i32
    scf.if %25 {
      %66 = arith.addi %0, %c5_i32 : i32
      %67 = arith.index_cast %66 : i32 to index
      %68 = memref.load %arg1[%67] : memref<16xi32, #tpu.memory_space<smem>>
      %c0_i32_17 = arith.constant 0 : i32
      %c31_i32 = arith.constant 31 : i32
      %69 = arith.maxsi %c0_i32_17, %68 : i32
      %70 = arith.minsi %c31_i32, %69 : i32
      %71 = arith.index_cast %70 : i32 to index
      %c0_18 = arith.constant 0 : index
      %72 = vector.load %arg3[%71, %c0_18] : memref<32x32xf32, #tpu.memory_space<vmem>>, vector<1x32xf32>
      %73 = arith.index_cast %c5_i32 : i32 to index
      %c0_19 = arith.constant 0 : index
      %74 = vector.load %arg4[%73, %c0_19] : memref<16x32xf32, #tpu.memory_space<vmem>>, vector<1x32xf32>
      tpu.vector_store %arg4[%73, %c0_19], %72 {strides = array<i32>} : memref<16x32xf32, #tpu.memory_space<vmem>>, vector<1x32xf32>,
    } else {
    }
    %c6_i32 = arith.constant 6 : i32
    %26 = arith.addi %0, %c6_i32 : i32
    %27 = arith.cmpi slt, %26, %1 : i32
    %28 = arith.extui %27 : i1 to i32
    %c0_i32_6 = arith.constant 0 : i32
    %29 = arith.cmpi ne, %28, %c0_i32_6 : i32
    scf.if %29 {
      %66 = arith.addi %0, %c6_i32 : i32
      %67 = arith.index_cast %66 : i32 to index
      %68 = memref.load %arg1[%67] : memref<16xi32, #tpu.memory_space<smem>>
      %c0_i32_17 = arith.constant 0 : i32
      %c31_i32 = arith.constant 31 : i32
      %69 = arith.maxsi %c0_i32_17, %68 : i32
      %70 = arith.minsi %c31_i32, %69 : i32
      %71 = arith.index_cast %70 : i32 to index
      %c0_18 = arith.constant 0 : index
      %72 = vector.load %arg3[%71, %c0_18] : memref<32x32xf32, #tpu.memory_space<vmem>>, vector<1x32xf32>
      %73 = arith.index_cast %c6_i32 : i32 to index
      %c0_19 = arith.constant 0 : index
      %74 = vector.load %arg4[%73, %c0_19] : memref<16x32xf32, #tpu.memory_space<vmem>>, vector<1x32xf32>
      tpu.vector_store %arg4[%73, %c0_19], %72 {strides = array<i32>} : memref<16x32xf32, #tpu.memory_space<vmem>>, vector<1x32xf32>,
    } else {
    }
    %c7_i32 = arith.constant 7 : i32
    %30 = arith.addi %0, %c7_i32 : i32
    %31 = arith.cmpi slt, %30, %1 : i32
    %32 = arith.extui %31 : i1 to i32
    %c0_i32_7 = arith.constant 0 : i32
    %33 = arith.cmpi ne, %32, %c0_i32_7 : i32
    scf.if %33 {
      %66 = arith.addi %0, %c7_i32 : i32
      %67 = arith.index_cast %66 : i32 to index
      %68 = memref.load %arg1[%67] : memref<16xi32, #tpu.memory_space<smem>>
      %c0_i32_17 = arith.constant 0 : i32
      %c31_i32 = arith.constant 31 : i32
      %69 = arith.maxsi %c0_i32_17, %68 : i32
      %70 = arith.minsi %c31_i32, %69 : i32
      %71 = arith.index_cast %70 : i32 to index
      %c0_18 = arith.constant 0 : index
      %72 = vector.load %arg3[%71, %c0_18] : memref<32x32xf32, #tpu.memory_space<vmem>>, vector<1x32xf32>
      %73 = arith.index_cast %c7_i32 : i32 to index
      %c0_19 = arith.constant 0 : index
      %74 = vector.load %arg4[%73, %c0_19] : memref<16x32xf32, #tpu.memory_space<vmem>>, vector<1x32xf32>
      tpu.vector_store %arg4[%73, %c0_19], %72 {strides = array<i32>} : memref<16x32xf32, #tpu.memory_space<vmem>>, vector<1x32xf32>,
    } else {
    }
    %c8_i32 = arith.constant 8 : i32
    %34 = arith.addi %0, %c8_i32 : i32
    %35 = arith.cmpi slt, %34, %1 : i32
    %36 = arith.extui %35 : i1 to i32
    %c0_i32_8 = arith.constant 0 : i32
    %37 = arith.cmpi ne, %36, %c0_i32_8 : i32
    scf.if %37 {
      %66 = arith.addi %0, %c8_i32 : i32
      %67 = arith.index_cast %66 : i32 to index
      %68 = memref.load %arg1[%67] : memref<16xi32, #tpu.memory_space<smem>>
      %c0_i32_17 = arith.constant 0 : i32
      %c31_i32 = arith.constant 31 : i32
      %69 = arith.maxsi %c0_i32_17, %68 : i32
      %70 = arith.minsi %c31_i32, %69 : i32
      %71 = arith.index_cast %70 : i32 to index
      %c0_18 = arith.constant 0 : index
      %72 = vector.load %arg3[%71, %c0_18] : memref<32x32xf32, #tpu.memory_space<vmem>>, vector<1x32xf32>
      %73 = arith.index_cast %c8_i32 : i32 to index
      %c0_19 = arith.constant 0 : index
      %74 = vector.load %arg4[%73, %c0_19] : memref<16x32xf32, #tpu.memory_space<vmem>>, vector<1x32xf32>
      tpu.vector_store %arg4[%73, %c0_19], %72 {strides = array<i32>} : memref<16x32xf32, #tpu.memory_space<vmem>>, vector<1x32xf32>,
    } else {
    }
    %c9_i32 = arith.constant 9 : i32
    %38 = arith.addi %0, %c9_i32 : i32
    %39 = arith.cmpi slt, %38, %1 : i32
    %40 = arith.extui %39 : i1 to i32
    %c0_i32_9 = arith.constant 0 : i32
    %41 = arith.cmpi ne, %40, %c0_i32_9 : i32
    scf.if %41 {
      %66 = arith.addi %0, %c9_i32 : i32
      %67 = arith.index_cast %66 : i32 to index
      %68 = memref.load %arg1[%67] : memref<16xi32, #tpu.memory_space<smem>>
      %c0_i32_17 = arith.constant 0 : i32
      %c31_i32 = arith.constant 31 : i32
      %69 = arith.maxsi %c0_i32_17, %68 : i32
      %70 = arith.minsi %c31_i32, %69 : i32
      %71 = arith.index_cast %70 : i32 to index
      %c0_18 = arith.constant 0 : index
      %72 = vector.load %arg3[%71, %c0_18] : memref<32x32xf32, #tpu.memory_space<vmem>>, vector<1x32xf32>
      %73 = arith.index_cast %c9_i32 : i32 to index
      %c0_19 = arith.constant 0 : index
      %74 = vector.load %arg4[%73, %c0_19] : memref<16x32xf32, #tpu.memory_space<vmem>>, vector<1x32xf32>
      tpu.vector_store %arg4[%73, %c0_19], %72 {strides = array<i32>} : memref<16x32xf32, #tpu.memory_space<vmem>>, vector<1x32xf32>,
    } else {
    }
    %c10_i32 = arith.constant 10 : i32
    %42 = arith.addi %0, %c10_i32 : i32
    %43 = arith.cmpi slt, %42, %1 : i32
    %44 = arith.extui %43 : i1 to i32
    %c0_i32_10 = arith.constant 0 : i32
    %45 = arith.cmpi ne, %44, %c0_i32_10 : i32
    scf.if %45 {
      %66 = arith.addi %0, %c10_i32 : i32
      %67 = arith.index_cast %66 : i32 to index
      %68 = memref.load %arg1[%67] : memref<16xi32, #tpu.memory_space<smem>>
      %c0_i32_17 = arith.constant 0 : i32
      %c31_i32 = arith.constant 31 : i32
      %69 = arith.maxsi %c0_i32_17, %68 : i32
      %70 = arith.minsi %c31_i32, %69 : i32
      %71 = arith.index_cast %70 : i32 to index
      %c0_18 = arith.constant 0 : index
      %72 = vector.load %arg3[%71, %c0_18] : memref<32x32xf32, #tpu.memory_space<vmem>>, vector<1x32xf32>
      %73 = arith.index_cast %c10_i32 : i32 to index
      %c0_19 = arith.constant 0 : index
      %74 = vector.load %arg4[%73, %c0_19] : memref<16x32xf32, #tpu.memory_space<vmem>>, vector<1x32xf32>
      tpu.vector_store %arg4[%73, %c0_19], %72 {strides = array<i32>} : memref<16x32xf32, #tpu.memory_space<vmem>>, vector<1x32xf32>,
    } else {
    }
    %c11_i32 = arith.constant 11 : i32
    %46 = arith.addi %0, %c11_i32 : i32
    %47 = arith.cmpi slt, %46, %1 : i32
    %48 = arith.extui %47 : i1 to i32
    %c0_i32_11 = arith.constant 0 : i32
    %49 = arith.cmpi ne, %48, %c0_i32_11 : i32
    scf.if %49 {
      %66 = arith.addi %0, %c11_i32 : i32
      %67 = arith.index_cast %66 : i32 to index
      %68 = memref.load %arg1[%67] : memref<16xi32, #tpu.memory_space<smem>>
      %c0_i32_17 = arith.constant 0 : i32
      %c31_i32 = arith.constant 31 : i32
      %69 = arith.maxsi %c0_i32_17, %68 : i32
      %70 = arith.minsi %c31_i32, %69 : i32
      %71 = arith.index_cast %70 : i32 to index
      %c0_18 = arith.constant 0 : index
      %72 = vector.load %arg3[%71, %c0_18] : memref<32x32xf32, #tpu.memory_space<vmem>>, vector<1x32xf32>
      %73 = arith.index_cast %c11_i32 : i32 to index
      %c0_19 = arith.constant 0 : index
      %74 = vector.load %arg4[%73, %c0_19] : memref<16x32xf32, #tpu.memory_space<vmem>>, vector<1x32xf32>
      tpu.vector_store %arg4[%73, %c0_19], %72 {strides = array<i32>} : memref<16x32xf32, #tpu.memory_space<vmem>>, vector<1x32xf32>,
    } else {
    }
    %c12_i32 = arith.constant 12 : i32
    %50 = arith.addi %0, %c12_i32 : i32
    %51 = arith.cmpi slt, %50, %1 : i32
    %52 = arith.extui %51 : i1 to i32
    %c0_i32_12 = arith.constant 0 : i32
    %53 = arith.cmpi ne, %52, %c0_i32_12 : i32
    scf.if %53 {
      %66 = arith.addi %0, %c12_i32 : i32
      %67 = arith.index_cast %66 : i32 to index
      %68 = memref.load %arg1[%67] : memref<16xi32, #tpu.memory_space<smem>>
      %c0_i32_17 = arith.constant 0 : i32
      %c31_i32 = arith.constant 31 : i32
      %69 = arith.maxsi %c0_i32_17, %68 : i32
      %70 = arith.minsi %c31_i32, %69 : i32
      %71 = arith.index_cast %70 : i32 to index
      %c0_18 = arith.constant 0 : index
      %72 = vector.load %arg3[%71, %c0_18] : memref<32x32xf32, #tpu.memory_space<vmem>>, vector<1x32xf32>
      %73 = arith.index_cast %c12_i32 : i32 to index
      %c0_19 = arith.constant 0 : index
      %74 = vector.load %arg4[%73, %c0_19] : memref<16x32xf32, #tpu.memory_space<vmem>>, vector<1x32xf32>
      tpu.vector_store %arg4[%73, %c0_19], %72 {strides = array<i32>} : memref<16x32xf32, #tpu.memory_space<vmem>>, vector<1x32xf32>,
    } else {
    }
    %c13_i32 = arith.constant 13 : i32
    %54 = arith.addi %0, %c13_i32 : i32
    %55 = arith.cmpi slt, %54, %1 : i32
    %56 = arith.extui %55 : i1 to i32
    %c0_i32_13 = arith.constant 0 : i32
    %57 = arith.cmpi ne, %56, %c0_i32_13 : i32
    scf.if %57 {
      %66 = arith.addi %0, %c13_i32 : i32
      %67 = arith.index_cast %66 : i32 to index
      %68 = memref.load %arg1[%67] : memref<16xi32, #tpu.memory_space<smem>>
      %c0_i32_17 = arith.constant 0 : i32
      %c31_i32 = arith.constant 31 : i32
      %69 = arith.maxsi %c0_i32_17, %68 : i32
      %70 = arith.minsi %c31_i32, %69 : i32
      %71 = arith.index_cast %70 : i32 to index
      %c0_18 = arith.constant 0 : index
      %72 = vector.load %arg3[%71, %c0_18] : memref<32x32xf32, #tpu.memory_space<vmem>>, vector<1x32xf32>
      %73 = arith.index_cast %c13_i32 : i32 to index
      %c0_19 = arith.constant 0 : index
      %74 = vector.load %arg4[%73, %c0_19] : memref<16x32xf32, #tpu.memory_space<vmem>>, vector<1x32xf32>
      tpu.vector_store %arg4[%73, %c0_19], %72 {strides = array<i32>} : memref<16x32xf32, #tpu.memory_space<vmem>>, vector<1x32xf32>,
    } else {
    }
    %c14_i32 = arith.constant 14 : i32
    %58 = arith.addi %0, %c14_i32 : i32
    %59 = arith.cmpi slt, %58, %1 : i32
    %60 = arith.extui %59 : i1 to i32
    %c0_i32_14 = arith.constant 0 : i32
    %61 = arith.cmpi ne, %60, %c0_i32_14 : i32
    scf.if %61 {
      %66 = arith.addi %0, %c14_i32 : i32
      %67 = arith.index_cast %66 : i32 to index
      %68 = memref.load %arg1[%67] : memref<16xi32, #tpu.memory_space<smem>>
      %c0_i32_17 = arith.constant 0 : i32
      %c31_i32 = arith.constant 31 : i32
      %69 = arith.maxsi %c0_i32_17, %68 : i32
      %70 = arith.minsi %c31_i32, %69 : i32
      %71 = arith.index_cast %70 : i32 to index
      %c0_18 = arith.constant 0 : index
      %72 = vector.load %arg3[%71, %c0_18] : memref<32x32xf32, #tpu.memory_space<vmem>>, vector<1x32xf32>
      %73 = arith.index_cast %c14_i32 : i32 to index
      %c0_19 = arith.constant 0 : index
      %74 = vector.load %arg4[%73, %c0_19] : memref<16x32xf32, #tpu.memory_space<vmem>>, vector<1x32xf32>
      tpu.vector_store %arg4[%73, %c0_19], %72 {strides = array<i32>} : memref<16x32xf32, #tpu.memory_space<vmem>>, vector<1x32xf32>,
    } else {
    }
    %c15_i32 = arith.constant 15 : i32
    %62 = arith.addi %0, %c15_i32 : i32
    %63 = arith.cmpi slt, %62, %1 : i32
    %64 = arith.extui %63 : i1 to i32
    %c0_i32_15 = arith.constant 0 : i32
    %65 = arith.cmpi ne, %64, %c0_i32_15 : i32
    scf.if %65 {
      %66 = arith.addi %0, %c15_i32 : i32
      %67 = arith.index_cast %66 : i32 to index
      %68 = memref.load %arg1[%67] : memref<16xi32, #tpu.memory_space<smem>>
      %c0_i32_17 = arith.constant 0 : i32
      %c31_i32 = arith.constant 31 : i32
      %69 = arith.maxsi %c0_i32_17, %68 : i32
      %70 = arith.minsi %c31_i32, %69 : i32
      %71 = arith.index_cast %70 : i32 to index
      %c0_18 = arith.constant 0 : index
      %72 = vector.load %arg3[%71, %c0_18] : memref<32x32xf32, #tpu.memory_space<vmem>>, vector<1x32xf32>
      %73 = arith.index_cast %c15_i32 : i32 to index
      %c0_19 = arith.constant 0 : index
      %74 = vector.load %arg4[%73, %c0_19] : memref<16x32xf32, #tpu.memory_space<vmem>>, vector<1x32xf32>
      tpu.vector_store %arg4[%73, %c0_19], %72 {strides = array<i32>} : memref<16x32xf32, #tpu.memory_space<vmem>>, vector<1x32xf32>,
    } else {
    }
    %c16_i32_16 = arith.constant 16 : i32
    return
  }
  func.func @transform_0(%arg0: i32, %arg1: memref<16xi32, #tpu.memory_space<smem>>, %arg2: memref<1xi32, #tpu.memory_space<smem>>) -> (i32, i32) {
    %c0_i32 = arith.constant 0 : i32
    %c0_i32_0 = arith.constant 0 : i32
    %c0_i32_1 = arith.constant 0 : i32
    return %c0_i32, %c0_i32_0 : i32, i32
  }
  func.func @transform_1(%arg0: i32, %arg1: memref<16xi32, #tpu.memory_space<smem>>, %arg2: memref<1xi32, #tpu.memory_space<smem>>) -> (i32, i32) {
    %c0_i32 = arith.constant 0 : i32
    %c0_i32_0 = arith.constant 0 : i32
    return %arg0, %c0_i32 : i32, i32
  }
}

module attributes {stable_mosaic.version = 11 : i64} {
  func.func @_vmem_gather_kernel(%arg0: i32, %arg1: memref<16xi32, #tpu.memory_space<smem>>, %arg2: memref<1xi32, #tpu.memory_space<smem>>, %arg3: memref<32x32xf32, #tpu.memory_space<vmem>>, %arg4: memref<16x32xf32, #tpu.memory_space<vmem>>) attributes {dimension_semantics = [#tpu.dimension_semantics<parallel>], iteration_bounds = array<i64: 1>, scalar_prefetch = 2 : i64, scratch_operands = 0 : i64, tpu.core_type = #tpu.core_type<tc>, window_params = [{pipeline_mode = #tpu.pipeline_mode<synchronous>, transform_indices = @transform_0, window_bounds = array<i64: 32, 32>}, {transform_indices = @transform_1, window_bounds = array<i64: 16, 32>}]} {
    %c16_i32 = arith.constant 16 : i32
    %0 = arith.muli %arg0, %c16_i32 : i32
    %c0 = arith.constant 0 : index
    %1 = memref.load %arg2[%c0] : memref<1xi32, #tpu.memory_space<smem>>
    %c0_i32 = arith.constant 0 : i32
    %2 = arith.addi %0, %c0_i32 : i32
    %3 = arith.cmpi slt, %2, %1 : i32
    %4 = arith.extui %3 : i1 to i32
    %c0_i32_0 = arith.constant 0 : i32
    %5 = arith.cmpi ne, %4, %c0_i32_0 : i32
    scf.if %5 {
      %66 = arith.addi %0, %c0_i32 : i32
      %67 = arith.index_cast %66 : i32 to index
      %68 = memref.load %arg1[%67] : memref<16xi32, #tpu.memory_space<smem>>
      %c0_i32_17 = arith.constant 0 : i32
      %c31_i32 = arith.constant 31 : i32
      %69 = arith.maxsi %c0_i32_17, %68 : i32
      %70 = arith.minsi %c31_i32, %69 : i32
      %71 = arith.index_cast %70 : i32 to index
      %c0_18 = arith.constant 0 : index
      %72 = vector.load %arg3[%71, %c0_18] : memref<32x32xf32, #tpu.memory_space<vmem>>, vector<1x32xf32>
      %73 = arith.index_cast %c0_i32 : i32 to index
      %c0_19 = arith.constant 0 : index
      %74 = vector.load %arg4[%73, %c0_19] : memref<16x32xf32, #tpu.memory_space<vmem>>, vector<1x32xf32>
      tpu.vector_store %arg4[%73, %c0_19], %72 {strides = array<i32>} : memref<16x32xf32, #tpu.memory_space<vmem>>, vector<1x32xf32>,
    } else {
    }
    %c1_i32 = arith.constant 1 : i32
    %6 = arith.addi %0, %c1_i32 : i32
    %7 = arith.cmpi slt, %6, %1 : i32
    %8 = arith.extui %7 : i1 to i32
    %c0_i32_1 = arith.constant 0 : i32
    %9 = arith.cmpi ne, %8, %c0_i32_1 : i32
    scf.if %9 {
      %66 = arith.addi %0, %c1_i32 : i32
      %67 = arith.index_cast %66 : i32 to index
      %68 = memref.load %arg1[%67] : memref<16xi32, #tpu.memory_space<smem>>
      %c0_i32_17 = arith.constant 0 : i32
      %c31_i32 = arith.constant 31 : i32
      %69 = arith.maxsi %c0_i32_17, %68 : i32
      %70 = arith.minsi %c31_i32, %69 : i32
      %71 = arith.index_cast %70 : i32 to index
      %c0_18 = arith.constant 0 : index
      %72 = vector.load %arg3[%71, %c0_18] : memref<32x32xf32, #tpu.memory_space<vmem>>, vector<1x32xf32>
      %73 = arith.index_cast %c1_i32 : i32 to index
      %c0_19 = arith.constant 0 : index
      %74 = vector.load %arg4[%73, %c0_19] : memref<16x32xf32, #tpu.memory_space<vmem>>, vector<1x32xf32>
      tpu.vector_store %arg4[%73, %c0_19], %72 {strides = array<i32>} : memref<16x32xf32, #tpu.memory_space<vmem>>, vector<1x32xf32>,
    } else {
    }
    %c2_i32 = arith.constant 2 : i32
    %10 = arith.addi %0, %c2_i32 : i32
    %11 = arith.cmpi slt, %10, %1 : i32
    %12 = arith.extui %11 : i1 to i32
    %c0_i32_2 = arith.constant 0 : i32
    %13 = arith.cmpi ne, %12, %c0_i32_2 : i32
    scf.if %13 {
      %66 = arith.addi %0, %c2_i32 : i32
      %67 = arith.index_cast %66 : i32 to index
      %68 = memref.load %arg1[%67] : memref<16xi32, #tpu.memory_space<smem>>
      %c0_i32_17 = arith.constant 0 : i32
      %c31_i32 = arith.constant 31 : i32
      %69 = arith.maxsi %c0_i32_17, %68 : i32
      %70 = arith.minsi %c31_i32, %69 : i32
      %71 = arith.index_cast %70 : i32 to index
      %c0_18 = arith.constant 0 : index
      %72 = vector.load %arg3[%71, %c0_18] : memref<32x32xf32, #tpu.memory_space<vmem>>, vector<1x32xf32>
      %73 = arith.index_cast %c2_i32 : i32 to index
      %c0_19 = arith.constant 0 : index
      %74 = vector.load %arg4[%73, %c0_19] : memref<16x32xf32, #tpu.memory_space<vmem>>, vector<1x32xf32>
      tpu.vector_store %arg4[%73, %c0_19], %72 {strides = array<i32>} : memref<16x32xf32, #tpu.memory_space<vmem>>, vector<1x32xf32>,
    } else {
    }
    %c3_i32 = arith.constant 3 : i32
    %14 = arith.addi %0, %c3_i32 : i32
    %15 = arith.cmpi slt, %14, %1 : i32
    %16 = arith.extui %15 : i1 to i32
    %c0_i32_3 = arith.constant 0 : i32
    %17 = arith.cmpi ne, %16, %c0_i32_3 : i32
    scf.if %17 {
      %66 = arith.addi %0, %c3_i32 : i32
      %67 = arith.index_cast %66 : i32 to index
      %68 = memref.load %arg1[%67] : memref<16xi32, #tpu.memory_space<smem>>
      %c0_i32_17 = arith.constant 0 : i32
      %c31_i32 = arith.constant 31 : i32
      %69 = arith.maxsi %c0_i32_17, %68 : i32
      %70 = arith.minsi %c31_i32, %69 : i32
      %71 = arith.index_cast %70 : i32 to index
      %c0_18 = arith.constant 0 : index
      %72 = vector.load %arg3[%71, %c0_18] : memref<32x32xf32, #tpu.memory_space<vmem>>, vector<1x32xf32>
      %73 = arith.index_cast %c3_i32 : i32 to index
      %c0_19 = arith.constant 0 : index
      %74 = vector.load %arg4[%73, %c0_19] : memref<16x32xf32, #tpu.memory_space<vmem>>, vector<1x32xf32>
      tpu.vector_store %arg4[%73, %c0_19], %72 {strides = array<i32>} : memref<16x32xf32, #tpu.memory_space<vmem>>, vector<1x32xf32>,
    } else {
    }
    %c4_i32 = arith.constant 4 : i32
    %18 = arith.addi %0, %c4_i32 : i32
    %19 = arith.cmpi slt, %18, %1 : i32
    %20 = arith.extui %19 : i1 to i32
    %c0_i32_4 = arith.constant 0 : i32
    %21 = arith.cmpi ne, %20, %c0_i32_4 : i32
    scf.if %21 {
      %66 = arith.addi %0, %c4_i32 : i32
      %67 = arith.index_cast %66 : i32 to index
      %68 = memref.load %arg1[%67] : memref<16xi32, #tpu.memory_space<smem>>
      %c0_i32_17 = arith.constant 0 : i32
      %c31_i32 = arith.constant 31 : i32
      %69 = arith.maxsi %c0_i32_17, %68 : i32
      %70 = arith.minsi %c31_i32, %69 : i32
      %71 = arith.index_cast %70 : i32 to index
      %c0_18 = arith.constant 0 : index
      %72 = vector.load %arg3[%71, %c0_18] : memref<32x32xf32, #tpu.memory_space<vmem>>, vector<1x32xf32>
      %73 = arith.index_cast %c4_i32 : i32 to index
      %c0_19 = arith.constant 0 : index
      %74 = vector.load %arg4[%73, %c0_19] : memref<16x32xf32, #tpu.memory_space<vmem>>, vector<1x32xf32>
      tpu.vector_store %arg4[%73, %c0_19], %72 {strides = array<i32>} : memref<16x32xf32, #tpu.memory_space<vmem>>, vector<1x32xf32>,
    } else {
    }
    %c5_i32 = arith.constant 5 : i32
    %22 = arith.addi %0, %c5_i32 : i32
    %23 = arith.cmpi slt, %22, %1 : i32
    %24 = arith.extui %23 : i1 to i32
    %c0_i32_5 = arith.constant 0 : i32
    %25 = arith.cmpi ne, %24, %c0_i32_5 : i32
    scf.if %25 {
      %66 = arith.addi %0, %c5_i32 : i32
      %67 = arith.index_cast %66 : i32 to index
      %68 = memref.load %arg1[%67] : memref<16xi32, #tpu.memory_space<smem>>
      %c0_i32_17 = arith.constant 0 : i32
      %c31_i32 = arith.constant 31 : i32
      %69 = arith.maxsi %c0_i32_17, %68 : i32
      %70 = arith.minsi %c31_i32, %69 : i32
      %71 = arith.index_cast %70 : i32 to index
      %c0_18 = arith.constant 0 : index
      %72 = vector.load %arg3[%71, %c0_18] : memref<32x32xf32, #tpu.memory_space<vmem>>, vector<1x32xf32>
      %73 = arith.index_cast %c5_i32 : i32 to index
      %c0_19 = arith.constant 0 : index
      %74 = vector.load %arg4[%73, %c0_19] : memref<16x32xf32, #tpu.memory_space<vmem>>, vector<1x32xf32>
      tpu.vector_store %arg4[%73, %c0_19], %72 {strides = array<i32>} : memref<16x32xf32, #tpu.memory_space<vmem>>, vector<1x32xf32>,
    } else {
    }
    %c6_i32 = arith.constant 6 : i32
    %26 = arith.addi %0, %c6_i32 : i32
    %27 = arith.cmpi slt, %26, %1 : i32
    %28 = arith.extui %27 : i1 to i32
    %c0_i32_6 = arith.constant 0 : i32
    %29 = arith.cmpi ne, %28, %c0_i32_6 : i32
    scf.if %29 {
      %66 = arith.addi %0, %c6_i32 : i32
      %67 = arith.index_cast %66 : i32 to index
      %68 = memref.load %arg1[%67] : memref<16xi32, #tpu.memory_space<smem>>
      %c0_i32_17 = arith.constant 0 : i32
      %c31_i32 = arith.constant 31 : i32
      %69 = arith.maxsi %c0_i32_17, %68 : i32
      %70 = arith.minsi %c31_i32, %69 : i32
      %71 = arith.index_cast %70 : i32 to index
      %c0_18 = arith.constant 0 : index
      %72 = vector.load %arg3[%71, %c0_18] : memref<32x32xf32, #tpu.memory_space<vmem>>, vector<1x32xf32>
      %73 = arith.index_cast %c6_i32 : i32 to index
      %c0_19 = arith.constant 0 : index
      %74 = vector.load %arg4[%73, %c0_19] : memref<16x32xf32, #tpu.memory_space<vmem>>, vector<1x32xf32>
      tpu.vector_store %arg4[%73, %c0_19], %72 {strides = array<i32>} : memref<16x32xf32, #tpu.memory_space<vmem>>, vector<1x32xf32>,
    } else {
    }
    %c7_i32 = arith.constant 7 : i32
    %30 = arith.addi %0, %c7_i32 : i32
    %31 = arith.cmpi slt, %30, %1 : i32
    %32 = arith.extui %31 : i1 to i32
    %c0_i32_7 = arith.constant 0 : i32
    %33 = arith.cmpi ne, %32, %c0_i32_7 : i32
    scf.if %33 {
      %66 = arith.addi %0, %c7_i32 : i32
      %67 = arith.index_cast %66 : i32 to index
      %68 = memref.load %arg1[%67] : memref<16xi32, #tpu.memory_space<smem>>
      %c0_i32_17 = arith.constant 0 : i32
      %c31_i32 = arith.constant 31 : i32
      %69 = arith.maxsi %c0_i32_17, %68 : i32
      %70 = arith.minsi %c31_i32, %69 : i32
      %71 = arith.index_cast %70 : i32 to index
      %c0_18 = arith.constant 0 : index
      %72 = vector.load %arg3[%71, %c0_18] : memref<32x32xf32, #tpu.memory_space<vmem>>, vector<1x32xf32>
      %73 = arith.index_cast %c7_i32 : i32 to index
      %c0_19 = arith.constant 0 : index
      %74 = vector.load %arg4[%73, %c0_19] : memref<16x32xf32, #tpu.memory_space<vmem>>, vector<1x32xf32>
      tpu.vector_store %arg4[%73, %c0_19], %72 {strides = array<i32>} : memref<16x32xf32, #tpu.memory_space<vmem>>, vector<1x32xf32>,
    } else {
    }
    %c8_i32 = arith.constant 8 : i32
    %34 = arith.addi %0, %c8_i32 : i32
    %35 = arith.cmpi slt, %34, %1 : i32
    %36 = arith.extui %35 : i1 to i32
    %c0_i32_8 = arith.constant 0 : i32
    %37 = arith.cmpi ne, %36, %c0_i32_8 : i32
    scf.if %37 {
      %66 = arith.addi %0, %c8_i32 : i32
      %67 = arith.index_cast %66 : i32 to index
      %68 = memref.load %arg1[%67] : memref<16xi32, #tpu.memory_space<smem>>
      %c0_i32_17 = arith.constant 0 : i32
      %c31_i32 = arith.constant 31 : i32
      %69 = arith.maxsi %c0_i32_17, %68 : i32
      %70 = arith.minsi %c31_i32, %69 : i32
      %71 = arith.index_cast %70 : i32 to index
      %c0_18 = arith.constant 0 : index
      %72 = vector.load %arg3[%71, %c0_18] : memref<32x32xf32, #tpu.memory_space<vmem>>, vector<1x32xf32>
      %73 = arith.index_cast %c8_i32 : i32 to index
      %c0_19 = arith.constant 0 : index
      %74 = vector.load %arg4[%73, %c0_19] : memref<16x32xf32, #tpu.memory_space<vmem>>, vector<1x32xf32>
      tpu.vector_store %arg4[%73, %c0_19], %72 {strides = array<i32>} : memref<16x32xf32, #tpu.memory_space<vmem>>, vector<1x32xf32>,
    } else {
    }
    %c9_i32 = arith.constant 9 : i32
    %38 = arith.addi %0, %c9_i32 : i32
    %39 = arith.cmpi slt, %38, %1 : i32
    %40 = arith.extui %39 : i1 to i32
    %c0_i32_9 = arith.constant 0 : i32
    %41 = arith.cmpi ne, %40, %c0_i32_9 : i32
    scf.if %41 {
      %66 = arith.addi %0, %c9_i32 : i32
      %67 = arith.index_cast %66 : i32 to index
      %68 = memref.load %arg1[%67] : memref<16xi32, #tpu.memory_space<smem>>
      %c0_i32_17 = arith.constant 0 : i32
      %c31_i32 = arith.constant 31 : i32
      %69 = arith.maxsi %c0_i32_17, %68 : i32
      %70 = arith.minsi %c31_i32, %69 : i32
      %71 = arith.index_cast %70 : i32 to index
      %c0_18 = arith.constant 0 : index
      %72 = vector.load %arg3[%71, %c0_18] : memref<32x32xf32, #tpu.memory_space<vmem>>, vector<1x32xf32>
      %73 = arith.index_cast %c9_i32 : i32 to index
      %c0_19 = arith.constant 0 : index
      %74 = vector.load %arg4[%73, %c0_19] : memref<16x32xf32, #tpu.memory_space<vmem>>, vector<1x32xf32>
      tpu.vector_store %arg4[%73, %c0_19], %72 {strides = array<i32>} : memref<16x32xf32, #tpu.memory_space<vmem>>, vector<1x32xf32>,
    } else {
    }
    %c10_i32 = arith.constant 10 : i32
    %42 = arith.addi %0, %c10_i32 : i32
    %43 = arith.cmpi slt, %42, %1 : i32
    %44 = arith.extui %43 : i1 to i32
    %c0_i32_10 = arith.constant 0 : i32
    %45 = arith.cmpi ne, %44, %c0_i32_10 : i32
    scf.if %45 {
      %66 = arith.addi %0, %c10_i32 : i32
      %67 = arith.index_cast %66 : i32 to index
      %68 = memref.load %arg1[%67] : memref<16xi32, #tpu.memory_space<smem>>
      %c0_i32_17 = arith.constant 0 : i32
      %c31_i32 = arith.constant 31 : i32
      %69 = arith.maxsi %c0_i32_17, %68 : i32
      %70 = arith.minsi %c31_i32, %69 : i32
      %71 = arith.index_cast %70 : i32 to index
      %c0_18 = arith.constant 0 : index
      %72 = vector.load %arg3[%71, %c0_18] : memref<32x32xf32, #tpu.memory_space<vmem>>, vector<1x32xf32>
      %73 = arith.index_cast %c10_i32 : i32 to index
      %c0_19 = arith.constant 0 : index
      %74 = vector.load %arg4[%73, %c0_19] : memref<16x32xf32, #tpu.memory_space<vmem>>, vector<1x32xf32>
      tpu.vector_store %arg4[%73, %c0_19], %72 {strides = array<i32>} : memref<16x32xf32, #tpu.memory_space<vmem>>, vector<1x32xf32>,
    } else {
    }
    %c11_i32 = arith.constant 11 : i32
    %46 = arith.addi %0, %c11_i32 : i32
    %47 = arith.cmpi slt, %46, %1 : i32
    %48 = arith.extui %47 : i1 to i32
    %c0_i32_11 = arith.constant 0 : i32
    %49 = arith.cmpi ne, %48, %c0_i32_11 : i32
    scf.if %49 {
      %66 = arith.addi %0, %c11_i32 : i32
      %67 = arith.index_cast %66 : i32 to index
      %68 = memref.load %arg1[%67] : memref<16xi32, #tpu.memory_space<smem>>
      %c0_i32_17 = arith.constant 0 : i32
      %c31_i32 = arith.constant 31 : i32
      %69 = arith.maxsi %c0_i32_17, %68 : i32
      %70 = arith.minsi %c31_i32, %69 : i32
      %71 = arith.index_cast %70 : i32 to index
      %c0_18 = arith.constant 0 : index
      %72 = vector.load %arg3[%71, %c0_18] : memref<32x32xf32, #tpu.memory_space<vmem>>, vector<1x32xf32>
      %73 = arith.index_cast %c11_i32 : i32 to index
      %c0_19 = arith.constant 0 : index
      %74 = vector.load %arg4[%73, %c0_19] : memref<16x32xf32, #tpu.memory_space<vmem>>, vector<1x32xf32>
      tpu.vector_store %arg4[%73, %c0_19], %72 {strides = array<i32>} : memref<16x32xf32, #tpu.memory_space<vmem>>, vector<1x32xf32>,
    } else {
    }
    %c12_i32 = arith.constant 12 : i32
    %50 = arith.addi %0, %c12_i32 : i32
    %51 = arith.cmpi slt, %50, %1 : i32
    %52 = arith.extui %51 : i1 to i32
    %c0_i32_12 = arith.constant 0 : i32
    %53 = arith.cmpi ne, %52, %c0_i32_12 : i32
    scf.if %53 {
      %66 = arith.addi %0, %c12_i32 : i32
      %67 = arith.index_cast %66 : i32 to index
      %68 = memref.load %arg1[%67] : memref<16xi32, #tpu.memory_space<smem>>
      %c0_i32_17 = arith.constant 0 : i32
      %c31_i32 = arith.constant 31 : i32
      %69 = arith.maxsi %c0_i32_17, %68 : i32
      %70 = arith.minsi %c31_i32, %69 : i32
      %71 = arith.index_cast %70 : i32 to index
      %c0_18 = arith.constant 0 : index
      %72 = vector.load %arg3[%71, %c0_18] : memref<32x32xf32, #tpu.memory_space<vmem>>, vector<1x32xf32>
      %73 = arith.index_cast %c12_i32 : i32 to index
      %c0_19 = arith.constant 0 : index
      %74 = vector.load %arg4[%73, %c0_19] : memref<16x32xf32, #tpu.memory_space<vmem>>, vector<1x32xf32>
      tpu.vector_store %arg4[%73, %c0_19], %72 {strides = array<i32>} : memref<16x32xf32, #tpu.memory_space<vmem>>, vector<1x32xf32>,
    } else {
    }
    %c13_i32 = arith.constant 13 : i32
    %54 = arith.addi %0, %c13_i32 : i32
    %55 = arith.cmpi slt, %54, %1 : i32
    %56 = arith.extui %55 : i1 to i32
    %c0_i32_13 = arith.constant 0 : i32
    %57 = arith.cmpi ne, %56, %c0_i32_13 : i32
    scf.if %57 {
      %66 = arith.addi %0, %c13_i32 : i32
      %67 = arith.index_cast %66 : i32 to index
      %68 = memref.load %arg1[%67] : memref<16xi32, #tpu.memory_space<smem>>
      %c0_i32_17 = arith.constant 0 : i32
      %c31_i32 = arith.constant 31 : i32
      %69 = arith.maxsi %c0_i32_17, %68 : i32
      %70 = arith.minsi %c31_i32, %69 : i32
      %71 = arith.index_cast %70 : i32 to index
      %c0_18 = arith.constant 0 : index
      %72 = vector.load %arg3[%71, %c0_18] : memref<32x32xf32, #tpu.memory_space<vmem>>, vector<1x32xf32>
      %73 = arith.index_cast %c13_i32 : i32 to index
      %c0_19 = arith.constant 0 : index
      %74 = vector.load %arg4[%73, %c0_19] : memref<16x32xf32, #tpu.memory_space<vmem>>, vector<1x32xf32>
      tpu.vector_store %arg4[%73, %c0_19], %72 {strides = array<i32>} : memref<16x32xf32, #tpu.memory_space<vmem>>, vector<1x32xf32>,
    } else {
    }
    %c14_i32 = arith.constant 14 : i32
    %58 = arith.addi %0, %c14_i32 : i32
    %59 = arith.cmpi slt, %58, %1 : i32
    %60 = arith.extui %59 : i1 to i32
    %c0_i32_14 = arith.constant 0 : i32
    %61 = arith.cmpi ne, %60, %c0_i32_14 : i32
    scf.if %61 {
      %66 = arith.addi %0, %c14_i32 : i32
      %67 = arith.index_cast %66 : i32 to index
      %68 = memref.load %arg1[%67] : memref<16xi32, #tpu.memory_space<smem>>
      %c0_i32_17 = arith.constant 0 : i32
      %c31_i32 = arith.constant 31 : i32
      %69 = arith.maxsi %c0_i32_17, %68 : i32
      %70 = arith.minsi %c31_i32, %69 : i32
      %71 = arith.index_cast %70 : i32 to index
      %c0_18 = arith.constant 0 : index
      %72 = vector.load %arg3[%71, %c0_18] : memref<32x32xf32, #tpu.memory_space<vmem>>, vector<1x32xf32>
      %73 = arith.index_cast %c14_i32 : i32 to index
      %c0_19 = arith.constant 0 : index
      %74 = vector.load %arg4[%73, %c0_19] : memref<16x32xf32, #tpu.memory_space<vmem>>, vector<1x32xf32>
      tpu.vector_store %arg4[%73, %c0_19], %72 {strides = array<i32>} : memref<16x32xf32, #tpu.memory_space<vmem>>, vector<1x32xf32>,
    } else {
    }
    %c15_i32 = arith.constant 15 : i32
    %62 = arith.addi %0, %c15_i32 : i32
    %63 = arith.cmpi slt, %62, %1 : i32
    %64 = arith.extui %63 : i1 to i32
    %c0_i32_15 = arith.constant 0 : i32
    %65 = arith.cmpi ne, %64, %c0_i32_15 : i32
    scf.if %65 {
      %66 = arith.addi %0, %c15_i32 : i32
      %67 = arith.index_cast %66 : i32 to index
      %68 = memref.load %arg1[%67] : memref<16xi32, #tpu.memory_space<smem>>
      %c0_i32_17 = arith.constant 0 : i32
      %c31_i32 = arith.constant 31 : i32
      %69 = arith.maxsi %c0_i32_17, %68 : i32
      %70 = arith.minsi %c31_i32, %69 : i32
      %71 = arith.index_cast %70 : i32 to index
      %c0_18 = arith.constant 0 : index
      %72 = vector.load %arg3[%71, %c0_18] : memref<32x32xf32, #tpu.memory_space<vmem>>, vector<1x32xf32>
      %73 = arith.index_cast %c15_i32 : i32 to index
      %c0_19 = arith.constant 0 : index
      %74 = vector.load %arg4[%73, %c0_19] : memref<16x32xf32, #tpu.memory_space<vmem>>, vector<1x32xf32>
      tpu.vector_store %arg4[%73, %c0_19], %72 {strides = array<i32>} : memref<16x32xf32, #tpu.memory_space<vmem>>, vector<1x32xf32>,
    } else {
    }
    %c16_i32_16 = arith.constant 16 : i32
    return
  }
  func.func @transform_0(%arg0: i32, %arg1: memref<16xi32, #tpu.memory_space<smem>>, %arg2: memref<1xi32, #tpu.memory_space<smem>>) -> (i32, i32) {
    %c0_i32 = arith.constant 0 : i32
    %c0_i32_0 = arith.constant 0 : i32
    %c0_i32_1 = arith.constant 0 : i32
    return %c0_i32, %c0_i32_0 : i32, i32
  }
  func.func @transform_1(%arg0: i32, %arg1: memref<16xi32, #tpu.memory_space<smem>>, %arg2: memref<1xi32, #tpu.memory_space<smem>>) -> (i32, i32) {
    %c0_i32 = arith.constant 0 : i32
    %c0_i32_0 = arith.constant 0 : i32
    return %arg0, %c0_i32 : i32, i32
  }
}

</mosaic_0001>

<bundles_post_ra>
// kernel: tpu_custom_call.1
= control target key start
LH: loop header
LB: loop body
LE: loop exit
PB: predicated region body
PF: predicated region fallthrough
CT: control target
= control target key end

     0   :  { %s622_s0 = inlined_call_operand.vmem [shape: s32[16], index: 0, kind: input, shape index: {}]   ;;  %s623_s1 = inlined_call_operand.<no memory space> [shape: s32[1], index: 1, kind: input, shape index: {}]   ;;  %s624_s2 = inlined_call_operand.hbm [shape: f32[32,32], index: 2, kind: input, shape index: {}]   ;;  %s625_s3 = inlined_call_operand.hbm [shape: f32[16,32], index: 3, kind: output, shape index: {}]  }
   0x1   :  { %s8_s14 = sshll.u32 %s622_s0, 4  ;;  %s9_s14 = int_to_ptr.vmem [resolvable:$true] %s8_s14 }
   0x2   :  { %s454_s15 = scalar_lea.vmem %s9_s14, 16  ;;  %p459_p1 = scmp.lt.s32.totalorder %s9_s14, %s9_s14 }
   0x3   :  { %p455_p0 = scmp.ne.s32.totalorder %s9_s14, %s454_s15  ;;  %p460_p2 = scmp.lt.s32.totalorder %s454_s15, %s454_s15 }
   0x5   :  { %p461_p3 = por %p460_p2, %p459_p1 }
   0x7   :  { %p462_p4 = pnand %p461_p3, %p455_p0 }
   0x9   :  { %465 = shalt.err (!%p462_p4)  }
   0xa   :  { %s516_s16 = smov [#allocation3]  }
   0xb   :  { %11 = dma.vmem_to_smem %s9_s14, 16, %s516_s16, [#allocation2] }
   0xc   :  { %510 = dma.done.wait [#allocation2], 16 }
   0xd   :  { %511 = vsyncadd [#allocation2], 4294967280 }
   0xe   :  { %14 = sfence }
   0xf   :  { %15 = vsyncpa [#allocation6], 0 }
  0x10   :  { %16 = vsyncpa [#allocation7], 0  ;;  %s517_s17 = smov [#allocation5]   ;;  %s466_s20 = scalar_lea.hbm %s624_s2, 512 }
  0x11   :  { %s22_s18 = sshll.u32 %s517_s17, 4  ;;  %p467_p5 = scmp.ne.s32.totalorder %s624_s2, %s466_s20  ;;  %s23_s18 = int_to_ptr.vmem [resolvable:$true] %s22_s18 }
  0x12   :  { %p470_p6 = scmp.lt.u32.totalorder %s466_s20, %s624_s2 }
  0x14   :  { %p472_p7 = pnand %p470_p6, %p467_p5 }
  0x16   :  { %475 = shalt.err (!%p472_p7)
}
  0x17   :  { %s476_s25 = scalar_lea.vmem %s23_s18, 512  ;;  %p481_p9 = scmp.lt.s32.totalorder %s23_s18, %s23_s18 }
  0x18   :  { %p477_p8 = scmp.ne.s32.totalorder %s23_s18, %s476_s25  ;;  %p482_p10 = scmp.lt.s32.totalorder %s476_s25, %s476_s25 }
  0x1a   :  { %p483_p11 = por %p482_p10, %p481_p9 }
  0x1c   :  { %p484_p12 = pnand %p483_p11, %p477_p8 }
  0x1e   :  { %487 = shalt.err (!%p484_p12)
}
  0x1f   :  { %s518_s26 = smov 128   ;;  %s519_s27 = smov 8  }
  0x20   :  { %28 = dma.hbm_to_vmem [thread:$0]  %s624_s2, 512, %s23_s18, [#allocation6], %s518_s26, %s518_s26, %s519_s27  }
  0x21   :  { %512 = dma.done.wait [#allocation6], 512  }
  0x22   :  { %513 = vsyncadd [#allocation6], 4294966784  ;;  %p291_p13 = scmp.le.s32.totalorder %s623_s1, 0 }
  0x23   :  { %s38_s5 = sld [smem:[#allocation3]] (!%p291_p13)  ;;  %vm45_vm0 = vcmask (!%p291_p13), 253952  }
  0x24   :  { %37 = sbr.rel (%p291_p13) target bundleno = 48 (0x30), region = 13 }
  0x29   :  { %p39_p0 = scmp.gt.s32.totalorder (!%p291_p13), %s38_s5, 0  ;;  %p292_p1 = scmp.lt.s32.totalorder (!%p291_p13), %s38_s5, 31 }
  0x2b   :  { %s627_s5 = smov (!%p39_p0, %s38_s5), 0 }
  0x2c   :  { %s629_s5 = smov (!%p292_p1, %s627_s5), 31 }
  0x2d   :  { %s43_s6 = scalar_lea.vmem [#allocation5], %s629_s5 }
  0x2e   :  { %v44_v0 = vld [vmem:[%s43_s6] sm:$0x1] }
  0x2f   :  { %46 = vst.msk [vmem:[#allocation8] sm:$0x1] %vm45_vm0, %v44_v0 }
  0x30 PF:  { %p298_p2 = scmp.le.s32.totalorder %s623_s1, 1 }
  0x31   :  { %s299_s2 = sld [smem:[#allocation3 + $0x1]] (!%p298_p2)  ;;  %vm59_vm1 = vcmask (!%p298_p2), 253952  }
  0x32   :  { %51 = sbr.rel (%p298_p2) target bundleno = 62 (0x3e), region = 17 }
  0x37   :  { %p53_p3 = scmp.gt.s32.totalorder (!%p298_p2), %s299_s2, 0  ;;  %p300_p4 = scmp.lt.s32.totalorder (!%p298_p2), %s299_s2, 31 }
  0x39   :  { %s631_s2 = smov (!%p53_p3, %s299_s2), 0 }
  0x3a   :  { %s633_s2 = smov (!%p300_p4, %s631_s2), 31 }
  0x3b   :  { %s57_s9 = scalar_lea.vmem [#allocation5], %s633_s2 }
  0x3c   :  { %v58_v1 = vld [vmem:[%s57_s9] sm:$0x1] }
  0x3d   :  { %60 = vst.msk [vmem:[#allocation8 + $0x1] sm:$0x1] %vm59_vm1, %v58_v1 }
  0x3e PF:  { %p306_p5 = scmp.le.s32.totalorder %s623_s1, 2 }
  0x3f   :  { %s307_s12 = sld [smem:[#allocation3 + $0x2]] (!%p306_p5)  ;;  %vm73_vm2 = vcmask (!%p306_p5), 253952  }
  0x40   :  { %65 = sbr.rel (%p306_p5) target bundleno = 76 (0x4c), region = 21 }
  0x45   :  { %p67_p6 = scmp.gt.s32.totalorder (!%p306_p5), %s307_s12, 0  ;;  %p308_p7 = scmp.lt.s32.totalorder (!%p306_p5), %s307_s12, 31 }
  0x47   :  { %s635_s12 = smov (!%p67_p6, %s307_s12), 0 }
  0x48   :  { %s637_s12 = smov (!%p308_p7, %s635_s12), 31 }
  0x49   :  { %s71_s13 = scalar_lea.vmem [#allocation5], %s637_s12 }
  0x4a   :  { %v72_v2 = vld [vmem:[%s71_s13] sm:$0x1] }
  0x4b   :  { %74 = vst.msk [vmem:[#allocation8 + $0x2] sm:$0x1] %vm73_vm2, %v72_v2 }
  0x4c PF:  { %p314_p8 = scmp.le.s32.totalorder %s623_s1, 3 }
  0x4d   :  { %s315_s16 = sld [smem:[#allocation3 + $0x3]] (!%p314_p8)  ;;  %vm87_vm3 = vcmask (!%p314_p8), 253952  }
  0x4e   :  { %79 = sbr.rel (%p314_p8) target bundleno = 90 (0x5a), region = 25 }
  0x53   :  { %p81_p9 = scmp.gt.s32.totalorder (!%p314_p8), %s315_s16, 0  ;;  %p316_p10 = scmp.lt.s32.totalorder (!%p314_p8), %s315_s16, 31 }
  0x55   :  { %s639_s16 = smov (!%p81_p9, %s315_s16), 0 }
  0x56   :  { %s641_s16 = smov (!%p316_p10, %s639_s16), 31 }
  0x57   :  { %s85_s17 = scalar_lea.vmem [#allocation5], %s641_s16 }
  0x58   :  { %v86_v3 = vld [vmem:[%s85_s17] sm:$0x1] }
  0x59   :  { %88 = vst.msk [vmem:[#allocation8 + $0x3] sm:$0x1] %vm87_vm3, %v86_v3 }
  0x5a PF:  { %p322_p11 = scmp.le.s32.totalorder %s623_s1, 4 }
  0x5b   :  { %s323_s0 = sld [smem:[#allocation3 + $0x4]] (!%p322_p11)  ;;  %vm101_vm4 = vcmask (!%p322_p11), 253952  }
  0x5c   :  { %93 = sbr.rel (%p322_p11) target bundleno = 104 (0x68), region = 29 }
  0x61   :  { %p95_p12 = scmp.gt.s32.totalorder (!%p322_p11), %s323_s0, 0  ;;  %p324_p13 = scmp.lt.s32.totalorder (!%p322_p11), %s323_s0, 31 }
  0x63   :  { %s643_s0 = smov (!%p95_p12, %s323_s0), 0 }
  0x64   :  { %s645_s0 = smov (!%p324_p13, %s643_s0), 31 }
  0x65   :  { %s99_s20 = scalar_lea.vmem [#allocation5], %s645_s0 }
  0x66   :  { %v100_v4 = vld [vmem:[%s99_s20] sm:$0x1] }
  0x67   :  { %102 = vst.msk [vmem:[#allocation8 + $0x4] sm:$0x1] %vm101_vm4, %v100_v4 }
  0x68 PF:  { %p330_p0 = scmp.le.s32.totalorder %s623_s1, 5 }
  0x69   :  { %s331_s23 = sld [smem:[#allocation3 + $0x5]] (!%p330_p0)  ;;  %vm115_vm5 = vcmask (!%p330_p0), 253952  }
  0x6a   :  { %107 = sbr.rel (%p330_p0) target bundleno = 118 (0x76), region = 33 }
  0x6f   :  { %p109_p1 = scmp.gt.s32.totalorder (!%p330_p0), %s331_s23, 0  ;;  %p332_p2 = scmp.lt.s32.totalorder (!%p330_p0), %s331_s23, 31 }
  0x71   :  { %s647_s23 = smov (!%p109_p1, %s331_s23), 0 }
  0x72   :  { %s649_s23 = smov (!%p332_p2, %s647_s23), 31 }
  0x73   :  { %s113_s24 = scalar_lea.vmem [#allocation5], %s649_s23 }
  0x74   :  { %v114_v5 = vld [vmem:[%s113_s24] sm:$0x1] }
  0x75   :  { %116 = vst.msk [vmem:[#allocation8 + $0x5] sm:$0x1] %vm115_vm5, %v114_v5 }
  0x76 PF:  { %p338_p3 = scmp.le.s32.totalorder %s623_s1, 6 }
  0x77   :  { %s339_s29 = sld [smem:[#allocation3 + $0x6]] (!%p338_p3)  ;;  %vm129_vm6 = vcmask (!%p338_p3), 253952  }
  0x78   :  { %121 = sbr.rel (%p338_p3) target bundleno = 132 (0x84), region = 37 }
  0x7d   :  { %p123_p4 = scmp.gt.s32.totalorder (!%p338_p3), %s339_s29, 0  ;;  %p340_p5 = scmp.lt.s32.totalorder (!%p338_p3), %s339_s29, 31 }
  0x7f   :  { %s651_s29 = smov (!%p123_p4, %s339_s29), 0 }
  0x80   :  { %s653_s29 = smov (!%p340_p5, %s651_s29), 31 }
  0x81   :  { %s127_s30 = scalar_lea.vmem [#allocation5], %s653_s29 }
  0x82   :  { %v128_v6 = vld [vmem:[%s127_s30] sm:$0x1] }
  0x83   :  { %130 = vst.msk [vmem:[#allocation8 + $0x6] sm:$0x1] %vm129_vm6, %v128_v6 }
  0x84 PF:  { %p346_p6 = scmp.le.s32.totalorder %s623_s1, 7 }
  0x85   :  { %s347_s6 = sld [smem:[#allocation3 + $0x7]] (!%p346_p6)  ;;  %vm143_vm7 = vcmask (!%p346_p6), 253952  }
  0x86   :  { %135 = sbr.rel (%p346_p6) target bundleno = 146 (0x92), region = 41 }
  0x8b   :  { %p137_p7 = scmp.gt.s32.totalorder (!%p346_p6), %s347_s6, 0  ;;  %p348_p8 = scmp.lt.s32.totalorder (!%p346_p6), %s347_s6, 31 }
  0x8d   :  { %s655_s6 = smov (!%p137_p7, %s347_s6), 0 }
  0x8e   :  { %s657_s6 = smov (!%p348_p8, %s655_s6), 31 }
  0x8f   :  { %s141_s7 = scalar_lea.vmem [#allocation5], %s657_s6 }
  0x90   :  { %v142_v7 = vld [vmem:[%s141_s7] sm:$0x1] }
  0x91   :  { %144 = vst.msk [vmem:[#allocation8 + $0x7] sm:$0x1] %vm143_vm7, %v142_v7 }
  0x92 PF:  { %p354_p9 = scmp.le.s32.totalorder %s623_s1, 8 }
  0x93   :  { %s355_s9 = sld [smem:[#allocation3 + $0x8]] (!%p354_p9)  ;;  %vm157_vm8 = vcmask (!%p354_p9), 253952  }
  0x94   :  { %149 = sbr.rel (%p354_p9) target bundleno = 160 (0xa0), region = 45 }
  0x99   :  { %p151_p10 = scmp.gt.s32.totalorder (!%p354_p9), %s355_s9, 0  ;;  %p356_p11 = scmp.lt.s32.totalorder (!%p354_p9), %s355_s9, 31 }
  0x9b   :  { %s659_s9 = smov (!%p151_p10, %s355_s9), 0 }
  0x9c   :  { %s661_s9 = smov (!%p356_p11, %s659_s9), 31 }
  0x9d   :  { %s155_s10 = scalar_lea.vmem [#allocation5], %s661_s9 }
  0x9e   :  { %v156_v8 = vld [vmem:[%s155_s10] sm:$0x1] }
  0x9f   :  { %158 = vst.msk [vmem:[#allocation8 + $0x8] sm:$0x1] %vm157_vm8, %v156_v8 }
  0xa0 PF:  { %p362_p12 = scmp.le.s32.totalorder %s623_s1, 9 }
  0xa1   :  { %s363_s13 = sld [smem:[#allocation3 + $0x9]] (!%p362_p12)  ;;  %vm171_vm9 = vcmask (!%p362_p12), 253952  }
  0xa2   :  { %163 = sbr.rel (%p362_p12) target bundleno = 174 (0xae), region = 49 }
  0xa7   :  { %p165_p13 = scmp.gt.s32.totalorder (!%p362_p12), %s363_s13, 0  ;;  %p364_p0 = scmp.lt.s32.totalorder (!%p362_p12), %s363_s13, 31 }
  0xa9   :  { %s663_s13 = smov (!%p165_p13, %s363_s13), 0 }
  0xaa   :  { %s665_s13 = smov (!%p364_p0, %s663_s13), 31 }
  0xab   :  { %s169_s14 = scalar_lea.vmem [#allocation5], %s665_s13 }
  0xac   :  { %v170_v9 = vld [vmem:[%s169_s14] sm:$0x1] }
  0xad   :  { %172 = vst.msk [vmem:[#allocation8 + $0x9] sm:$0x1] %vm171_vm9, %v170_v9 }
  0xae PF:  { %p370_p1 = scmp.le.s32.totalorder %s623_s1, 10 }
  0xaf   :  { %s371_s17 = sld [smem:[#allocation3 + $0xa]] (!%p370_p1)  ;;  %vm185_vm10 = vcmask (!%p370_p1), 253952  }
  0xb0   :  { %177 = sbr.rel (%p370_p1) target bundleno = 188 (0xbc), region = 53 }
  0xb5   :  { %p179_p2 = scmp.gt.s32.totalorder (!%p370_p1), %s371_s17, 0  ;;  %p372_p3 = scmp.lt.s32.totalorder (!%p370_p1), %s371_s17, 31 }
  0xb7   :  { %s667_s17 = smov (!%p179_p2, %s371_s17), 0 }
  0xb8   :  { %s669_s17 = smov (!%p372_p3, %s667_s17), 31 }
  0xb9   :  { %s183_s18 = scalar_lea.vmem [#allocation5], %s669_s17 }
  0xba   :  { %v184_v10 = vld [vmem:[%s183_s18] sm:$0x1] }
  0xbb   :  { %186 = vst.msk [vmem:[#allocation8 + $0xa] sm:$0x1] %vm185_vm10, %v184_v10 }
  0xbc PF:  { %p378_p4 = scmp.le.s32.totalorder %s623_s1, 11 }
  0xbd   :  { %s379_s20 = sld [smem:[#allocation3 + $0xb]] (!%p378_p4)  ;;  %vm199_vm11 = vcmask (!%p378_p4), 253952  }
  0xbe   :  { %191 = sbr.rel (%p378_p4) target bundleno = 202 (0xca), region = 57 }
  0xc3   :  { %p193_p5 = scmp.gt.s32.totalorder (!%p378_p4), %s379_s20, 0  ;;  %p380_p6 = scmp.lt.s32.totalorder (!%p378_p4), %s379_s20, 31 }
  0xc5   :  { %s671_s20 = smov (!%p193_p5, %s379_s20), 0 }
  0xc6   :  { %s673_s20 = smov (!%p380_p6, %s671_s20), 31 }
  0xc7   :  { %s197_s21 = scalar_lea.vmem [#allocation5], %s673_s20 }
  0xc8   :  { %v198_v11 = vld [vmem:[%s197_s21] sm:$0x1] }
  0xc9   :  { %200 = vst.msk [vmem:[#allocation8 + $0xb] sm:$0x1] %vm199_vm11, %v198_v11 }
  0xca PF:  { %p386_p7 = scmp.le.s32.totalorder %s623_s1, 12 }
  0xcb   :  { %s387_s24 = sld [smem:[#allocation3 + $0xc]] (!%p386_p7)  ;;  %vm213_vm12 = vcmask (!%p386_p7), 253952  }
  0xcc   :  { %205 = sbr.rel (%p386_p7) target bundleno = 216 (0xd8), region = 61 }
  0xd1   :  { %p207_p8 = scmp.gt.s32.totalorder (!%p386_p7), %s387_s24, 0  ;;  %p388_p9 = scmp.lt.s32.totalorder (!%p386_p7), %s387_s24, 31 }
  0xd3   :  { %s675_s24 = smov (!%p207_p8, %s387_s24), 0 }
  0xd4   :  { %s677_s24 = smov (!%p388_p9, %s675_s24), 31 }
  0xd5   :  { %s211_s25 = scalar_lea.vmem [#allocation5], %s677_s24 }
  0xd6   :  { %v212_v12 = vld [vmem:[%s211_s25] sm:$0x1] }
  0xd7   :  { %214 = vst.msk [vmem:[#allocation8 + $0xc] sm:$0x1] %vm213_vm12, %v212_v12 }
  0xd8 PF:  { %p394_p10 = scmp.le.s32.totalorder %s623_s1, 13 }
  0xd9   :  { %s395_s30 = sld [smem:[#allocation3 + $0xd]] (!%p394_p10)  ;;  %vm227_vm13 = vcmask (!%p394_p10), 253952  }
  0xda   :  { %219 = sbr.rel (%p394_p10) target bundleno = 230 (0xe6), region = 65 }
  0xdf   :  { %p221_p11 = scmp.gt.s32.totalorder (!%p394_p10), %s395_s30, 0  ;;  %p396_p12 = scmp.lt.s32.totalorder (!%p394_p10), %s395_s30, 31 }
  0xe1   :  { %s679_s30 = smov (!%p221_p11, %s395_s30), 0 }
  0xe2   :  { %s681_s30 = smov (!%p396_p12, %s679_s30), 31 }
  0xe3   :  { %s225_s4 = scalar_lea.vmem [#allocation5], %s681_s30 }
  0xe4   :  { %v226_v13 = vld [vmem:[%s225_s4] sm:$0x1] }
  0xe5   :  { %228 = vst.msk [vmem:[#allocation8 + $0xd] sm:$0x1] %vm227_vm13, %v226_v13 }
  0xe6 PF:  { %p402_p13 = scmp.le.s32.totalorder %s623_s1, 14 }
  0xe7   :  { %s403_s7 = sld [smem:[#allocation3 + $0xe]] (!%p402_p13)  ;;  %vm241_vm14 = vcmask (!%p402_p13), 253952  }
  0xe8   :  { %233 = sbr.rel (%p402_p13) target bundleno = 244 (0xf4), region = 69 }
  0xed   :  { %p235_p0 = scmp.gt.s32.totalorder (!%p402_p13), %s403_s7, 0  ;;  %p404_p1 = scmp.lt.s32.totalorder (!%p402_p13), %s403_s7, 31 }
  0xef   :  { %s683_s7 = smov (!%p235_p0, %s403_s7), 0 }
  0xf0   :  { %s685_s7 = smov (!%p404_p1, %s683_s7), 31 }
  0xf1   :  { %s239_s8 = scalar_lea.vmem [#allocation5], %s685_s7 }
  0xf2   :  { %v240_v14 = vld [vmem:[%s239_s8] sm:$0x1] }
  0xf3   :  { %242 = vst.msk [vmem:[#allocation8 + $0xe] sm:$0x1] %vm241_vm14, %v240_v14 }
  0xf4 PF:  { %p410_p2 = scmp.le.s32.totalorder %s623_s1, 15 }
  0xf5   :  { %s411_s10 = sld [smem:[#allocation3 + $0xf]] (!%p410_p2)  ;;  %vm255_vm15 = vcmask (!%p410_p2), 253952  }
  0xf6   :  { %247 = sbr.rel (%p410_p2) target bundleno = 258 (0x102), region = 73 }
  0xfb   :  { %p249_p3 = scmp.gt.s32.totalorder (!%p410_p2), %s411_s10, 0  ;;  %p412_p4 = scmp.lt.s32.totalorder (!%p410_p2), %s411_s10, 31 }
  0xfd   :  { %s687_s10 = smov (!%p249_p3, %s411_s10), 0 }
  0xfe   :  { %s689_s10 = smov (!%p412_p4, %s687_s10), 31 }
  0xff   :  { %s253_s11 = scalar_lea.vmem [#allocation5], %s689_s10 }
 0x100   :  { %v254_v15 = vld [vmem:[%s253_s11] sm:$0x1] }
 0x101   :  { %256 = vst.msk [vmem:[#allocation8 + $0xf] sm:$0x1] %vm255_vm15, %v254_v15 }
 0x102 PF:  { %s520_s12 = smov [#allocation8]  }
 0x103   :  { %s262_s13 = sshll.u32 %s520_s12, 4  ;;  %s263_s13 = int_to_ptr.vmem [resolvable:$true] %s262_s13 }
 0x104   :  { %s488_s14 = scalar_lea.vmem %s263_s13, 256  ;;  %p493_p6 = scmp.lt.s32.totalorder %s263_s13, %s263_s13 }
 0x105   :  { %p489_p5 = scmp.ne.s32.totalorder %s263_s13, %s488_s14  ;;  %p494_p7 = scmp.lt.s32.totalorder %s488_s14, %s488_s14 }
 0x107   :  { %p495_p8 = por %p494_p7, %p493_p6 }
 0x109   :  { %p496_p9 = pnand %p495_p8, %p489_p5 }
 0x10b   :  { %499 = shalt.err (!%p496_p9)
}
 0x10c   :  { %s500_s16 = scalar_lea.hbm %s625_s3, 256 }
 0x10d   :  { %p501_p10 = scmp.ne.s32.totalorder %s625_s3, %s500_s16  ;;  %p504_p11 = scmp.lt.u32.totalorder %s500_s16, %s625_s3 }
 0x10f   :  { %p506_p12 = pnand %p504_p11, %p501_p10 }
 0x111   :  { %509 = shalt.err (!%p506_p12)
}
 0x112   :  { %268 = dma.vmem_to_hbm [thread:$0]  %s263_s13, 256, %s625_s3, [#allocation7], %s518_s26, %s518_s26, %s519_s27  }
 0x113   :  { %514 = dma.done.wait [#allocation7], 256  }
 0x114   :  { %515 = vsyncadd [#allocation7], 4294967040 }
 0x115   :  { %272 = vsyncpa [#allocation6], 1 }
 0x116   :  { %273 = vsyncpa [#allocation7], 1 }

// kernel: tpu_custom_call.1
= control target key start
LH: loop header
LB: loop body
LE: loop exit
PB: predicated region body
PF: predicated region fallthrough
CT: control target
= control target key end

     0   :  { %s622_s0 = inlined_call_operand.vmem [shape: s32[16], index: 0, kind: input, shape index: {}]   ;;  %s623_s1 = inlined_call_operand.<no memory space> [shape: s32[1], index: 1, kind: input, shape index: {}]   ;;  %s624_s2 = inlined_call_operand.hbm [shape: f32[32,32], index: 2, kind: input, shape index: {}]   ;;  %s625_s3 = inlined_call_operand.hbm [shape: f32[16,32], index: 3, kind: output, shape index: {}]  }
   0x1   :  { %s8_s14 = sshll.u32 %s622_s0, 4  ;;  %s9_s14 = int_to_ptr.vmem [resolvable:$true] %s8_s14 }
   0x2   :  { %s454_s15 = scalar_lea.vmem %s9_s14, 16  ;;  %p459_p1 = scmp.lt.s32.totalorder %s9_s14, %s9_s14 }
   0x3   :  { %p455_p0 = scmp.ne.s32.totalorder %s9_s14, %s454_s15  ;;  %p460_p2 = scmp.lt.s32.totalorder %s454_s15, %s454_s15 }
   0x5   :  { %p461_p3 = por %p460_p2, %p459_p1 }
   0x7   :  { %p462_p4 = pnand %p461_p3, %p455_p0 }
   0x9   :  { %465 = shalt.err (!%p462_p4)  }
   0xa   :  { %s516_s16 = smov [#allocation3]  }
   0xb   :  { %11 = dma.vmem_to_smem %s9_s14, 16, %s516_s16, [#allocation2] }
   0xc   :  { %510 = dma.done.wait [#allocation2], 16 }
   0xd   :  { %511 = vsyncadd [#allocation2], 4294967280 }
   0xe   :  { %14 = sfence }
   0xf   :  { %15 = vsyncpa [#allocation6], 0 }
  0x10   :  { %16 = vsyncpa [#allocation7], 0  ;;  %s517_s17 = smov [#allocation5]   ;;  %s466_s20 = scalar_lea.hbm %s624_s2, 512 }
  0x11   :  { %s22_s18 = sshll.u32 %s517_s17, 4  ;;  %p467_p5 = scmp.ne.s32.totalorder %s624_s2, %s466_s20  ;;  %s23_s18 = int_to_ptr.vmem [resolvable:$true] %s22_s18 }
  0x12   :  { %p470_p6 = scmp.lt.u32.totalorder %s466_s20, %s624_s2 }
  0x14   :  { %p472_p7 = pnand %p470_p6, %p467_p5 }
  0x16   :  { %475 = shalt.err (!%p472_p7)
}
  0x17   :  { %s476_s25 = scalar_lea.vmem %s23_s18, 512  ;;  %p481_p9 = scmp.lt.s32.totalorder %s23_s18, %s23_s18 }
  0x18   :  { %p477_p8 = scmp.ne.s32.totalorder %s23_s18, %s476_s25  ;;  %p482_p10 = scmp.lt.s32.totalorder %s476_s25, %s476_s25 }
  0x1a   :  { %p483_p11 = por %p482_p10, %p481_p9 }
  0x1c   :  { %p484_p12 = pnand %p483_p11, %p477_p8 }
  0x1e   :  { %487 = shalt.err (!%p484_p12)
}
  0x1f   :  { %s518_s26 = smov 128   ;;  %s519_s27 = smov 8  }
  0x20   :  { %28 = dma.hbm_to_vmem [thread:$0]  %s624_s2, 512, %s23_s18, [#allocation6], %s518_s26, %s518_s26, %s519_s27  }
  0x21   :  { %512 = dma.done.wait [#allocation6], 512  }
  0x22   :  { %513 = vsyncadd [#allocation6], 4294966784  ;;  %p291_p13 = scmp.le.s32.totalorder %s623_s1, 0 }
  0x23   :  { %s38_s5 = sld [smem:[#allocation3]] (!%p291_p13)  ;;  %vm45_vm0 = vcmask (!%p291_p13), 253952  }
  0x24   :  { %37 = sbr.rel (%p291_p13) target bundleno = 48 (0x30), region = 13 }
  0x29   :  { %p39_p0 = scmp.gt.s32.totalorder (!%p291_p13), %s38_s5, 0  ;;  %p292_p1 = scmp.lt.s32.totalorder (!%p291_p13), %s38_s5, 31 }
  0x2b   :  { %s627_s5 = smov (!%p39_p0, %s38_s5), 0 }
  0x2c   :  { %s629_s5 = smov (!%p292_p1, %s627_s5), 31 }
  0x2d   :  { %s43_s6 = scalar_lea.vmem [#allocation5], %s629_s5 }
  0x2e   :  { %v44_v0 = vld [vmem:[%s43_s6] sm:$0x1] }
  0x2f   :  { %46 = vst.msk [vmem:[#allocation8] sm:$0x1] %vm45_vm0, %v44_v0 }
  0x30 PF:  { %p298_p2 = scmp.le.s32.totalorder %s623_s1, 1 }
  0x31   :  { %s299_s2 = sld [smem:[#allocation3 + $0x1]] (!%p298_p2)  ;;  %vm59_vm1 = vcmask (!%p298_p2), 253952  }
  0x32   :  { %51 = sbr.rel (%p298_p2) target bundleno = 62 (0x3e), region = 17 }
  0x37   :  { %p53_p3 = scmp.gt.s32.totalorder (!%p298_p2), %s299_s2, 0  ;;  %p300_p4 = scmp.lt.s32.totalorder (!%p298_p2), %s299_s2, 31 }
  0x39   :  { %s631_s2 = smov (!%p53_p3, %s299_s2), 0 }
  0x3a   :  { %s633_s2 = smov (!%p300_p4, %s631_s2), 31 }
  0x3b   :  { %s57_s9 = scalar_lea.vmem [#allocation5], %s633_s2 }
  0x3c   :  { %v58_v1 = vld [vmem:[%s57_s9] sm:$0x1] }
  0x3d   :  { %60 = vst.msk [vmem:[#allocation8 + $0x1] sm:$0x1] %vm59_vm1, %v58_v1 }
  0x3e PF:  { %p306_p5 = scmp.le.s32.totalorder %s623_s1, 2 }
  0x3f   :  { %s307_s12 = sld [smem:[#allocation3 + $0x2]] (!%p306_p5)  ;;  %vm73_vm2 = vcmask (!%p306_p5), 253952  }
  0x40   :  { %65 = sbr.rel (%p306_p5) target bundleno = 76 (0x4c), region = 21 }
  0x45   :  { %p67_p6 = scmp.gt.s32.totalorder (!%p306_p5), %s307_s12, 0  ;;  %p308_p7 = scmp.lt.s32.totalorder (!%p306_p5), %s307_s12, 31 }
  0x47   :  { %s635_s12 = smov (!%p67_p6, %s307_s12), 0 }
  0x48   :  { %s637_s12 = smov (!%p308_p7, %s635_s12), 31 }
  0x49   :  { %s71_s13 = scalar_lea.vmem [#allocation5], %s637_s12 }
  0x4a   :  { %v72_v2 = vld [vmem:[%s71_s13] sm:$0x1] }
  0x4b   :  { %74 = vst.msk [vmem:[#allocation8 + $0x2] sm:$0x1] %vm73_vm2, %v72_v2 }
  0x4c PF:  { %p314_p8 = scmp.le.s32.totalorder %s623_s1, 3 }
  0x4d   :  { %s315_s16 = sld [smem:[#allocation3 + $0x3]] (!%p314_p8)  ;;  %vm87_vm3 = vcmask (!%p314_p8), 253952  }
  0x4e   :  { %79 = sbr.rel (%p314_p8) target bundleno = 90 (0x5a), region = 25 }
  0x53   :  { %p81_p9 = scmp.gt.s32.totalorder (!%p314_p8), %s315_s16, 0  ;;  %p316_p10 = scmp.lt.s32.totalorder (!%p314_p8), %s315_s16, 31 }
  0x55   :  { %s639_s16 = smov (!%p81_p9, %s315_s16), 0 }
  0x56   :  { %s641_s16 = smov (!%p316_p10, %s639_s16), 31 }
  0x57   :  { %s85_s17 = scalar_lea.vmem [#allocation5], %s641_s16 }
  0x58   :  { %v86_v3 = vld [vmem:[%s85_s17] sm:$0x1] }
  0x59   :  { %88 = vst.msk [vmem:[#allocation8 + $0x3] sm:$0x1] %vm87_vm3, %v86_v3 }
  0x5a PF:  { %p322_p11 = scmp.le.s32.totalorder %s623_s1, 4 }
  0x5b   :  { %s323_s0 = sld [smem:[#allocation3 + $0x4]] (!%p322_p11)  ;;  %vm101_vm4 = vcmask (!%p322_p11), 253952  }
  0x5c   :  { %93 = sbr.rel (%p322_p11) target bundleno = 104 (0x68), region = 29 }
  0x61   :  { %p95_p12 = scmp.gt.s32.totalorder (!%p322_p11), %s323_s0, 0  ;;  %p324_p13 = scmp.lt.s32.totalorder (!%p322_p11), %s323_s0, 31 }
  0x63   :  { %s643_s0 = smov (!%p95_p12, %s323_s0), 0 }
  0x64   :  { %s645_s0 = smov (!%p324_p13, %s643_s0), 31 }
  0x65   :  { %s99_s20 = scalar_lea.vmem [#allocation5], %s645_s0 }
  0x66   :  { %v100_v4 = vld [vmem:[%s99_s20] sm:$0x1] }
  0x67   :  { %102 = vst.msk [vmem:[#allocation8 + $0x4] sm:$0x1] %vm101_vm4, %v100_v4 }
  0x68 PF:  { %p330_p0 = scmp.le.s32.totalorder %s623_s1, 5 }
  0x69   :  { %s331_s23 = sld [smem:[#allocation3 + $0x5]] (!%p330_p0)  ;;  %vm115_vm5 = vcmask (!%p330_p0), 253952  }
  0x6a   :  { %107 = sbr.rel (%p330_p0) target bundleno = 118 (0x76), region = 33 }
  0x6f   :  { %p109_p1 = scmp.gt.s32.totalorder (!%p330_p0), %s331_s23, 0  ;;  %p332_p2 = scmp.lt.s32.totalorder (!%p330_p0), %s331_s23, 31 }
  0x71   :  { %s647_s23 = smov (!%p109_p1, %s331_s23), 0 }
  0x72   :  { %s649_s23 = smov (!%p332_p2, %s647_s23), 31 }
  0x73   :  { %s113_s24 = scalar_lea.vmem [#allocation5], %s649_s23 }
  0x74   :  { %v114_v5 = vld [vmem:[%s113_s24] sm:$0x1] }
  0x75   :  { %116 = vst.msk [vmem:[#allocation8 + $0x5] sm:$0x1] %vm115_vm5, %v114_v5 }
  0x76 PF:  { %p338_p3 = scmp.le.s32.totalorder %s623_s1, 6 }
  0x77   :  { %s339_s29 = sld [smem:[#allocation3 + $0x6]] (!%p338_p3)  ;;  %vm129_vm6 = vcmask (!%p338_p3), 253952  }
  0x78   :  { %121 = sbr.rel (%p338_p3) target bundleno = 132 (0x84), region = 37 }
  0x7d   :  { %p123_p4 = scmp.gt.s32.totalorder (!%p338_p3), %s339_s29, 0  ;;  %p340_p5 = scmp.lt.s32.totalorder (!%p338_p3), %s339_s29, 31 }
  0x7f   :  { %s651_s29 = smov (!%p123_p4, %s339_s29), 0 }
  0x80   :  { %s653_s29 = smov (!%p340_p5, %s651_s29), 31 }
  0x81   :  { %s127_s30 = scalar_lea.vmem [#allocation5], %s653_s29 }
  0x82   :  { %v128_v6 = vld [vmem:[%s127_s30] sm:$0x1] }
  0x83   :  { %130 = vst.msk [vmem:[#allocation8 + $0x6] sm:$0x1] %vm129_vm6, %v128_v6 }
  0x84 PF:  { %p346_p6 = scmp.le.s32.totalorder %s623_s1, 7 }
  0x85   :  { %s347_s6 = sld [smem:[#allocation3 + $0x7]] (!%p346_p6)  ;;  %vm143_vm7 = vcmask (!%p346_p6), 253952  }
  0x86   :  { %135 = sbr.rel (%p346_p6) target bundleno = 146 (0x92), region = 41 }
  0x8b   :  { %p137_p7 = scmp.gt.s32.totalorder (!%p346_p6), %s347_s6, 0  ;;  %p348_p8 = scmp.lt.s32.totalorder (!%p346_p6), %s347_s6, 31 }
  0x8d   :  { %s655_s6 = smov (!%p137_p7, %s347_s6), 0 }
  0x8e   :  { %s657_s6 = smov (!%p348_p8, %s655_s6), 31 }
  0x8f   :  { %s141_s7 = scalar_lea.vmem [#allocation5], %s657_s6 }
  0x90   :  { %v142_v7 = vld [vmem:[%s141_s7] sm:$0x1] }
  0x91   :  { %144 = vst.msk [vmem:[#allocation8 + $0x7] sm:$0x1] %vm143_vm7, %v142_v7 }
  0x92 PF:  { %p354_p9 = scmp.le.s32.totalorder %s623_s1, 8 }
  0x93   :  { %s355_s9 = sld [smem:[#allocation3 + $0x8]] (!%p354_p9)  ;;  %vm157_vm8 = vcmask (!%p354_p9), 253952  }
  0x94   :  { %149 = sbr.rel (%p354_p9) target bundleno = 160 (0xa0), region = 45 }
  0x99   :  { %p151_p10 = scmp.gt.s32.totalorder (!%p354_p9), %s355_s9, 0  ;;  %p356_p11 = scmp.lt.s32.totalorder (!%p354_p9), %s355_s9, 31 }
  0x9b   :  { %s659_s9 = smov (!%p151_p10, %s355_s9), 0 }
  0x9c   :  { %s661_s9 = smov (!%p356_p11, %s659_s9), 31 }
  0x9d   :  { %s155_s10 = scalar_lea.vmem [#allocation5], %s661_s9 }
  0x9e   :  { %v156_v8 = vld [vmem:[%s155_s10] sm:$0x1] }
  0x9f   :  { %158 = vst.msk [vmem:[#allocation8 + $0x8] sm:$0x1] %vm157_vm8, %v156_v8 }
  0xa0 PF:  { %p362_p12 = scmp.le.s32.totalorder %s623_s1, 9 }
  0xa1   :  { %s363_s13 = sld [smem:[#allocation3 + $0x9]] (!%p362_p12)  ;;  %vm171_vm9 = vcmask (!%p362_p12), 253952  }
  0xa2   :  { %163 = sbr.rel (%p362_p12) target bundleno = 174 (0xae), region = 49 }
  0xa7   :  { %p165_p13 = scmp.gt.s32.totalorder (!%p362_p12), %s363_s13, 0  ;;  %p364_p0 = scmp.lt.s32.totalorder (!%p362_p12), %s363_s13, 31 }
  0xa9   :  { %s663_s13 = smov (!%p165_p13, %s363_s13), 0 }
  0xaa   :  { %s665_s13 = smov (!%p364_p0, %s663_s13), 31 }
  0xab   :  { %s169_s14 = scalar_lea.vmem [#allocation5], %s665_s13 }
  0xac   :  { %v170_v9 = vld [vmem:[%s169_s14] sm:$0x1] }
  0xad   :  { %172 = vst.msk [vmem:[#allocation8 + $0x9] sm:$0x1] %vm171_vm9, %v170_v9 }
  0xae PF:  { %p370_p1 = scmp.le.s32.totalorder %s623_s1, 10 }
  0xaf   :  { %s371_s17 = sld [smem:[#allocation3 + $0xa]] (!%p370_p1)  ;;  %vm185_vm10 = vcmask (!%p370_p1), 253952  }
  0xb0   :  { %177 = sbr.rel (%p370_p1) target bundleno = 188 (0xbc), region = 53 }
  0xb5   :  { %p179_p2 = scmp.gt.s32.totalorder (!%p370_p1), %s371_s17, 0  ;;  %p372_p3 = scmp.lt.s32.totalorder (!%p370_p1), %s371_s17, 31 }
  0xb7   :  { %s667_s17 = smov (!%p179_p2, %s371_s17), 0 }
  0xb8   :  { %s669_s17 = smov (!%p372_p3, %s667_s17), 31 }
  0xb9   :  { %s183_s18 = scalar_lea.vmem [#allocation5], %s669_s17 }
  0xba   :  { %v184_v10 = vld [vmem:[%s183_s18] sm:$0x1] }
  0xbb   :  { %186 = vst.msk [vmem:[#allocation8 + $0xa] sm:$0x1] %vm185_vm10, %v184_v10 }
  0xbc PF:  { %p378_p4 = scmp.le.s32.totalorder %s623_s1, 11 }
  0xbd   :  { %s379_s20 = sld [smem:[#allocation3 + $0xb]] (!%p378_p4)  ;;  %vm199_vm11 = vcmask (!%p378_p4), 253952  }
  0xbe   :  { %191 = sbr.rel (%p378_p4) target bundleno = 202 (0xca), region = 57 }
  0xc3   :  { %p193_p5 = scmp.gt.s32.totalorder (!%p378_p4), %s379_s20, 0  ;;  %p380_p6 = scmp.lt.s32.totalorder (!%p378_p4), %s379_s20, 31 }
  0xc5   :  { %s671_s20 = smov (!%p193_p5, %s379_s20), 0 }
  0xc6   :  { %s673_s20 = smov (!%p380_p6, %s671_s20), 31 }
  0xc7   :  { %s197_s21 = scalar_lea.vmem [#allocation5], %s673_s20 }
  0xc8   :  { %v198_v11 = vld [vmem:[%s197_s21] sm:$0x1] }
  0xc9   :  { %200 = vst.msk [vmem:[#allocation8 + $0xb] sm:$0x1] %vm199_vm11, %v198_v11 }
  0xca PF:  { %p386_p7 = scmp.le.s32.totalorder %s623_s1, 12 }
  0xcb   :  { %s387_s24 = sld [smem:[#allocation3 + $0xc]] (!%p386_p7)  ;;  %vm213_vm12 = vcmask (!%p386_p7), 253952  }
  0xcc   :  { %205 = sbr.rel (%p386_p7) target bundleno = 216 (0xd8), region = 61 }
  0xd1   :  { %p207_p8 = scmp.gt.s32.totalorder (!%p386_p7), %s387_s24, 0  ;;  %p388_p9 = scmp.lt.s32.totalorder (!%p386_p7), %s387_s24, 31 }
  0xd3   :  { %s675_s24 = smov (!%p207_p8, %s387_s24), 0 }
  0xd4   :  { %s677_s24 = smov (!%p388_p9, %s675_s24), 31 }
  0xd5   :  { %s211_s25 = scalar_lea.vmem [#allocation5], %s677_s24 }
  0xd6   :  { %v212_v12 = vld [vmem:[%s211_s25] sm:$0x1] }
  0xd7   :  { %214 = vst.msk [vmem:[#allocation8 + $0xc] sm:$0x1] %vm213_vm12, %v212_v12 }
  0xd8 PF:  { %p394_p10 = scmp.le.s32.totalorder %s623_s1, 13 }
  0xd9   :  { %s395_s30 = sld [smem:[#allocation3 + $0xd]] (!%p394_p10)  ;;  %vm227_vm13 = vcmask (!%p394_p10), 253952  }
  0xda   :  { %219 = sbr.rel (%p394_p10) target bundleno = 230 (0xe6), region = 65 }
  0xdf   :  { %p221_p11 = scmp.gt.s32.totalorder (!%p394_p10), %s395_s30, 0  ;;  %p396_p12 = scmp.lt.s32.totalorder (!%p394_p10), %s395_s30, 31 }
  0xe1   :  { %s679_s30 = smov (!%p221_p11, %s395_s30), 0 }
  0xe2   :  { %s681_s30 = smov (!%p396_p12, %s679_s30), 31 }
  0xe3   :  { %s225_s4 = scalar_lea.vmem [#allocation5], %s681_s30 }
  0xe4   :  { %v226_v13 = vld [vmem:[%s225_s4] sm:$0x1] }
  0xe5   :  { %228 = vst.msk [vmem:[#allocation8 + $0xd] sm:$0x1] %vm227_vm13, %v226_v13 }
  0xe6 PF:  { %p402_p13 = scmp.le.s32.totalorder %s623_s1, 14 }
  0xe7   :  { %s403_s7 = sld [smem:[#allocation3 + $0xe]] (!%p402_p13)  ;;  %vm241_vm14 = vcmask (!%p402_p13), 253952  }
  0xe8   :  { %233 = sbr.rel (%p402_p13) target bundleno = 244 (0xf4), region = 69 }
  0xed   :  { %p235_p0 = scmp.gt.s32.totalorder (!%p402_p13), %s403_s7, 0  ;;  %p404_p1 = scmp.lt.s32.totalorder (!%p402_p13), %s403_s7, 31 }
  0xef   :  { %s683_s7 = smov (!%p235_p0, %s403_s7), 0 }
  0xf0   :  { %s685_s7 = smov (!%p404_p1, %s683_s7), 31 }
  0xf1   :  { %s239_s8 = scalar_lea.vmem [#allocation5], %s685_s7 }
  0xf2   :  { %v240_v14 = vld [vmem:[%s239_s8] sm:$0x1] }
  0xf3   :  { %242 = vst.msk [vmem:[#allocation8 + $0xe] sm:$0x1] %vm241_vm14, %v240_v14 }
  0xf4 PF:  { %p410_p2 = scmp.le.s32.totalorder %s623_s1, 15 }
  0xf5   :  { %s411_s10 = sld [smem:[#allocation3 + $0xf]] (!%p410_p2)  ;;  %vm255_vm15 = vcmask (!%p410_p2), 253952  }
  0xf6   :  { %247 = sbr.rel (%p410_p2) target bundleno = 258 (0x102), region = 73 }
  0xfb   :  { %p249_p3 = scmp.gt.s32.totalorder (!%p410_p2), %s411_s10, 0  ;;  %p412_p4 = scmp.lt.s32.totalorder (!%p410_p2), %s411_s10, 31 }
  0xfd   :  { %s687_s10 = smov (!%p249_p3, %s411_s10), 0 }
  0xfe   :  { %s689_s10 = smov (!%p412_p4, %s687_s10), 31 }
  0xff   :  { %s253_s11 = scalar_lea.vmem [#allocation5], %s689_s10 }
 0x100   :  { %v254_v15 = vld [vmem:[%s253_s11] sm:$0x1] }
 0x101   :  { %256 = vst.msk [vmem:[#allocation8 + $0xf] sm:$0x1] %vm255_vm15, %v254_v15 }
 0x102 PF:  { %s520_s12 = smov [#allocation8]  }
 0x103   :  { %s262_s13 = sshll.u32 %s520_s12, 4  ;;  %s263_s13 = int_to_ptr.vmem [resolvable:$true] %s262_s13 }
 0x104   :  { %s488_s14 = scalar_lea.vmem %s263_s13, 256  ;;  %p493_p6 = scmp.lt.s32.totalorder %s263_s13, %s263_s13 }
 0x105   :  { %p489_p5 = scmp.ne.s32.totalorder %s263_s13, %s488_s14  ;;  %p494_p7 = scmp.lt.s32.totalorder %s488_s14, %s488_s14 }
 0x107   :  { %p495_p8 = por %p494_p7, %p493_p6 }
 0x109   :  { %p496_p9 = pnand %p495_p8, %p489_p5 }
 0x10b   :  { %499 = shalt.err (!%p496_p9)
}
 0x10c   :  { %s500_s16 = scalar_lea.hbm %s625_s3, 256 }
 0x10d   :  { %p501_p10 = scmp.ne.s32.totalorder %s625_s3, %s500_s16  ;;  %p504_p11 = scmp.lt.u32.totalorder %s500_s16, %s625_s3 }
 0x10f   :  { %p506_p12 = pnand %p504_p11, %p501_p10 }
 0x111   :  { %509 = shalt.err (!%p506_p12)
}
 0x112   :  { %268 = dma.vmem_to_hbm [thread:$0]  %s263_s13, 256, %s625_s3, [#allocation7], %s518_s26, %s518_s26, %s519_s27  }
 0x113   :  { %514 = dma.done.wait [#allocation7], 256  }
 0x114   :  { %515 = vsyncadd [#allocation7], 4294967040 }
 0x115   :  { %272 = vsyncpa [#allocation6], 1 }
 0x116   :  { %273 = vsyncpa [#allocation7], 1 }

</bundles_post_ra>
